<compile_context>
chip_gen: v5e
topology: v5e:2x2
jax: 0.10.0
libtpu: 0.0.40
codegen_flags: <defaults>
</compile_context>

<pallas_src>
import math
import numpy as np
import jax
import jax.numpy as jnp
from jax.experimental import pallas as pl
from jax.experimental.pallas import tpu as pltpu

# ----------------------------- module-consistent small config -------------------------------
SR        = 16000
N_FFT     = 64
HOP       = 16
N_MELS    = 16
CHANNELS  = 8
KSIZE     = 7
HIDDEN    = 32            # hidden_size
OUT_DIM   = 4             # output_dim
OUT_PAD   = 128           # lane-dense padded output width
BATCH     = 2
AUDIO_LEN = 128
F0_LEN    = 32            # raw f0 frames before resample_frames

N_FREQ    = N_FFT // 2 + 1
N_FRAMES  = AUDIO_LEN // HOP + 1          # center=True framing -> 9
TB        = N_FRAMES * BATCH              # 18 rows

LOG_EPS   = 1e-6          # TODO(synk): LogTransform eps not in the spec snippet; log(x+1e-6) assumed
NORM_EPS  = 1e-5          # Normalize2d('batch') ~ BatchNorm2d(1) eps
BN_EPS    = 1e-5          # BatchNorm1d eps
FMIN      = 32.7          # TODO(synk): FMIN/FMAX constants not in the spec snippet; assumed f0 range
FMAX      = 2000.0


def _conv_out_len(l, k=KSIZE, stride=2, pad=KSIZE // 2):
    return (l + 2 * pad - (k - 1) - 1) // stride + 1


L1     = _conv_out_len(N_MELS)      # 8
L2     = _conv_out_len(L1)          # 4
L_OUT  = _conv_out_len(L2)          # 2  (== MelEstimator.l_out)
GRU_IN = CHANNELS * L_OUT + 1       # conv features + f0 channel = 17


# --------------------------------- deterministic DSP constants ------------------------------
def _mel_filterbank_htk(sr, n_fft, n_mels, fmin=0.0, fmax=None):
    """librosa-style triangular filterbank, htk mel scale, slaney area norm."""
    if fmax is None:
        fmax = sr / 2.0
    n_freq = n_fft // 2 + 1
    fftfreqs = np.linspace(0.0, sr / 2.0, n_freq)

    def hz2mel(f):
        return 2595.0 * np.log10(1.0 + np.asarray(f, np.float64) / 700.0)

    def mel2hz(m):
        return 700.0 * (10.0 ** (np.asarray(m, np.float64) / 2595.0) - 1.0)

    mel_pts = np.linspace(hz2mel(fmin), hz2mel(fmax), n_mels + 2)
    hz_pts = mel2hz(mel_pts)
    fdiff = np.diff(hz_pts)
    ramps = hz_pts[:, None] - fftfreqs[None, :]
    weights = np.zeros((n_mels, n_freq))
    for i in range(n_mels):
        lower = -ramps[i] / fdiff[i]
        upper = ramps[i + 2] / fdiff[i + 1]
        weights[i] = np.maximum(0.0, np.minimum(lower, upper))
    enorm = 2.0 / (hz_pts[2:n_mels + 2] - hz_pts[:n_mels])
    weights *= enorm[:, None]
    return weights.astype(np.float32)                      # [n_mels, n_freq]


def _stft_weight():
    """Merged [n_fft, 2*n_freq] = [cos*win | -sin*win] so the STFT is one MXU push."""
    n = np.arange(N_FFT)
    k = np.arange(N_FREQ)
    ang = 2.0 * np.pi * np.outer(n, k) / N_FFT
    win = (0.5 - 0.5 * np.cos(2.0 * np.pi * n / N_FFT))[:, None]     # periodic hann
    return np.concatenate([np.cos(ang) * win, -np.sin(ang) * win], axis=1).astype(np.float32)


def _conv1d_dense(w, b, l_in, stride, pad, bn_gamma, bn_beta, bn_mean, bn_var, bn_eps=BN_EPS):
    """Exact unfold of Conv1d(+ eval-mode BatchNorm1d affine) into a dense matmul.

    w: [Co, Ci, K], b: [Co].  Input rows are flattened [Ci*l_in] (ci outer); output rows are
    flattened [Co*l_out] (co outer) — exactly torch's .view(B, T, C, l_out).view(B, T, -1) layout.
    """
    co_n, ci_n, k_n = w.shape
    l_out = (l_in + 2 * pad - (k_n - 1) - 1) // stride + 1
    scale = bn_gamma / np.sqrt(bn_var + bn_eps)
    shift = bn_beta - bn_mean * scale
    wd = np.zeros((ci_n * l_in, co_n * l_out), np.float64)
    bd = np.zeros((co_n * l_out,), np.float64)
    for co in range(co_n):
        for j in range(l_out):
            col = co * l_out + j
            bd[col] = b[co] * scale[co] + shift[co]
            for ci in range(ci_n):
                for kk in range(k_n):
                    ip = j * stride + kk - pad
                    if 0 <= ip < l_in:
                        wd[ci * l_in + ip, col] += w[co, ci, kk] * scale[co]
    return wd.astype(np.float32), bd.astype(np.float32)[None, :], l_out


def init_params(key):
    keys = jax.random.split(key, 16)
    ki = iter(keys)

    def u(k, shape, bound):
        return np.asarray(jax.random.uniform(k, shape, jnp.float32, -bound, bound), np.float64)

    # ---- conv stack (torch Conv1d default init), eval-mode BN folded into the dense matrices ----
    # TODO(synk): BatchNorm1d modeled in eval mode with init running stats (mean=0, var=1, affine
    # identity); training-mode per-batch statistics are not computed in-kernel.
    bn_g = np.ones(CHANNELS); bn_b = np.zeros(CHANNELS)
    bn_m = np.zeros(CHANNELS); bn_v = np.ones(CHANNELS)

    def conv_params(k_w, k_b, co, ci):
        bound = 1.0 / math.sqrt(ci * KSIZE)
        return u(k_w, (co, ci, KSIZE), bound), u(k_b, (co,), bound)

    w1r, b1r = conv_params(next(ki), next(ki), CHANNELS, 1)
    w2r, b2r = conv_params(next(ki), next(ki), CHANNELS, CHANNELS)
    w3r, b3r = conv_params(next(ki), next(ki), CHANNELS, CHANNELS)
    w1, b1, l1 = _conv1d_dense(w1r, b1r, N_MELS, 2, KSIZE // 2, bn_g, bn_b, bn_m, bn_v)
    w2, b2, l2 = _conv1d_dense(w2r, b2r, l1, 2, KSIZE // 2, bn_g, bn_b, bn_m, bn_v)
    w3, b3, l3 = _conv1d_dense(w3r, b3r, l2, 2, KSIZE // 2, bn_g, bn_b, bn_m, bn_v)
    assert (l1, l2, l3) == (L1, L2, L_OUT)

    # ---- GRU (num_layers=1, torch init, gate order r|z|n, weights stored transposed) ----
    kk = 1.0 / math.sqrt(HIDDEN)
    wih = u(next(ki), (GRU_IN, 3 * HIDDEN), kk)
    whh = u(next(ki), (HIDDEN, 3 * HIDDEN), kk)
    bih = u(next(ki), (1, 3 * HIDDEN), kk)
    bhh = u(next(ki), (1, 3 * HIDDEN), kk)
    # Host-fold the r/z hidden biases into the input bias; the n-gate hidden bias MUST stay
    # inside r*(W_hn h + b_hn), so it is kept separate.
    bih_eff = bih.copy()
    bih_eff[:, :2 * HIDDEN] += bhh[:, :2 * HIDDEN]
    bhh_n = bhh[:, 2 * HIDDEN:]

    # ---- output head, zero-padded to 128 lanes for an unmasked lane-dense output store ----
    w_out = u(next(ki), (HIDDEN, OUT_DIM), kk)
    b_out = u(next(ki), (1, OUT_DIM), kk)
    w_out_pad = np.zeros((HIDDEN, OUT_PAD), np.float64); w_out_pad[:, :OUT_DIM] = w_out
    b_out_pad = np.zeros((1, OUT_PAD), np.float64);      b_out_pad[:, :OUT_DIM] = b_out

    f32 = lambda a: jnp.asarray(np.asarray(a, np.float32))
    params = {
        "wstft": jnp.asarray(_stft_weight()),                              # [n_fft, 2*n_freq]
        "melw":  jnp.asarray(_mel_filterbank_htk(SR, N_FFT, N_MELS).T),    # [n_freq, n_mels]
        "w1": f32(w1), "b1": f32(b1),
        "w2": f32(w2), "b2": f32(b2),
        "w3": f32(w3), "b3": f32(b3),
        # split input weight: conv-feature rows | f0 row (avoids a lane concat in the kernel)
        "wih_x": f32(wih[:CHANNELS * L_OUT, :]),                           # [C*l_out, 3H]
        "wih_f": f32(wih[CHANNELS * L_OUT:, :]),                           # [1, 3H]
        "bih":   f32(bih_eff),                                             # [1, 3H] (b_hr/b_hz folded)
        "whh":   f32(whh),                                                 # [H, 3H]
        "bhh_n": f32(bhh_n),                                               # [1, H]
        "w_out": f32(w_out_pad),                                           # [H, 128]
        "b_out": f32(b_out_pad),                                           # [1, 128]
    }
    return params


# ---------------------------------------- fused kernel --------------------------------------
def _f0mel_kernel(frames_ref, f0_ref,
                  wstft_ref, melw_ref,
                  w1_ref, b1_ref, w2_ref, b2_ref, w3_ref, b3_ref,
                  wih_x_ref, wih_f_ref, bih_ref, whh_ref, bhh_n_ref,
                  wout_ref, bout_ref,
                  out_ref):
    B, T, H = BATCH, N_FRAMES, HIDDEN

    # 1) STFT as one merged matmul, then magnitude (MelSpectrogram power=1.0).
    frames = frames_ref[...]                                                # [T*B, n_fft], time-major rows
    spec = jnp.dot(frames, wstft_ref[...], preferred_element_type=jnp.float32)   # [T*B, 2*n_freq]
    re = spec[:, :N_FREQ]
    im = spec[:, N_FREQ:]
    mag = jnp.sqrt(re * re + im * im)

    # 2) mel filterbank + LogTransform.
    mel = jnp.dot(mag, melw_ref[...], preferred_element_type=jnp.float32)   # [T*B, n_mels]
    logmel = jnp.log(mel + LOG_EPS)

    # 3) Normalize2d('batch'): single-pass whole-tensor standardization (sum + sumsq).
    # TODO(synk): exact Normalize2d source not in the spec; BatchNorm2d(1) training-style
    # whole-tensor statistics assumed (permutation invariant, so layout does not matter).
    inv_n = 1.0 / float(T * B * N_MELS)
    s = jnp.sum(logmel)
    ss = jnp.sum(logmel * logmel)
    mu = s * inv_n
    var = ss * inv_n - mu * mu
    x = (logmel - mu) * jax.lax.rsqrt(var + NORM_EPS)

    # 4) Conv1d + BN + ReLU stack as dense matmuls (exact unfold, BN affine pre-folded).
    h1 = jnp.maximum(jnp.dot(x, w1_ref[...], preferred_element_type=jnp.float32) + b1_ref[...], 0.0)
    h2 = jnp.maximum(jnp.dot(h1, w2_ref[...], preferred_element_type=jnp.float32) + b2_ref[...], 0.0)
    h3 = jnp.maximum(jnp.dot(h2, w3_ref[...], preferred_element_type=jnp.float32) + b3_ref[...], 0.0)
    # h3: [T*B, C*l_out]  ==  torch x.view(B, T, C*l_out) rows (time-major here)

    # 5) GRU. Input projection hoisted out of the recurrence; the f0 channel of torch.cat([x, f0])
    #    folds in as a rank-1 (broadcast) update: [h3 | f0] @ Wih == h3 @ Wih[:-1] + f0 * Wih[-1].
    gi_all = (jnp.dot(h3, wih_x_ref[...], preferred_element_type=jnp.float32)
              + f0_ref[...] * wih_f_ref[...]
              + bih_ref[...])                                               # [T*B, 3H]

    # Invariant loads / broadcasts hoisted out of the unrolled recurrence.
    whh = whh_ref[...]                                                      # [H, 3H]
    bhh_n = jnp.broadcast_to(bhh_n_ref[...], (B, H))                        # [B, H]

    h = jnp.zeros((B, H), jnp.float32)
    hs = []
    for t in range(T):   # static full unroll (T=9) so adjacent steps interleave around the h dep
        gi = gi_all[t * B:(t + 1) * B, :]
        gh = jnp.dot(h, whh, preferred_element_type=jnp.float32)            # [B, 3H], no bias (folded)
        r = jax.nn.sigmoid(gi[:, 0 * H:1 * H] + gh[:, 0 * H:1 * H])
        z = jax.nn.sigmoid(gi[:, 1 * H:2 * H] + gh[:, 1 * H:2 * H])
        n = jnp.tanh(gi[:, 2 * H:3 * H] + r * (gh[:, 2 * H:3 * H] + bhh_n))
        h = (1.0 - z) * n + z * h
        hs.append(h)

    # 6) output head: Linear + sigmoid over all T*B rows at once, register-resident hidden sequence,
    #    lane-dense (128-wide) unmasked output store.
    hseq = jnp.concatenate(hs, axis=0)                                      # [T*B, H], stays in vregs
    y = jnp.dot(hseq, wout_ref[...], preferred_element_type=jnp.float32) + bout_ref[...]
    out_ref[...] = jax.nn.sigmoid(y)                                        # [T*B, 128]


def f0mel_fused(frames_tb, f0_col, params):
    flops = 2 * TB * (N_FFT * 2 * N_FREQ + N_FREQ * N_MELS
                      + N_MELS * CHANNELS * L1
                      + CHANNELS * L1 * CHANNELS * L2
                      + CHANNELS * L2 * CHANNELS * L_OUT
                      + CHANNELS * L_OUT * 3 * HIDDEN
                      + HIDDEN * 3 * HIDDEN          # recurrence (T steps of B rows == TB rows)
                      + HIDDEN * OUT_PAD)
    transcendentals = TB * (N_FREQ + N_MELS + 3 * HIDDEN + OUT_PAD)
    bytes_accessed = 4 * (int(frames_tb.size) + int(f0_col.size)
                          + sum(int(v.size) for v in params.values())
                          + TB * OUT_PAD)
    return pl.pallas_call(
        _f0mel_kernel,
        out_shape=jax.ShapeDtypeStruct((TB, OUT_PAD), jnp.float32),
        cost_estimate=pl.CostEstimate(flops=flops,
                                      transcendentals=transcendentals,
                                      bytes_accessed=bytes_accessed),
    )(frames_tb, f0_col,
      params["wstft"], params["melw"],
      params["w1"], params["b1"], params["w2"], params["b2"], params["w3"], params["b3"],
      params["wih_x"], params["wih_f"], params["bih"], params["whh"], params["bhh_n"],
      params["w_out"], params["b_out"])


# --------------------------------------- forward pass ---------------------------------------
def f0mel_estimator_forward(audio, f0, params):
    T = N_FRAMES
    pad = N_FFT // 2
    audio_pad = jnp.pad(audio, ((0, 0), (pad, pad)), mode="reflect")        # center=True padding

    # Pre-frame in the wrapper (tiny [T*B, n_fft] matrix; avoids unaligned in-kernel lane slices
    # and masked 2-sublane scratch stores).  Time-major rows: row t*B + b <-> (frame t, batch b).
    win_idx = jnp.arange(T)[:, None] * HOP + jnp.arange(N_FFT)[None, :]     # [T, n_fft]
    frames = jnp.take(audio_pad, win_idx, axis=1)                            # [B, T, n_fft]
    frames_tb = jnp.transpose(frames, (1, 0, 2)).reshape(T * BATCH, N_FFT)

    # resample_frames(f0, n_frames) + (f0 - FMIN) / (FMAX - FMIN)
    # TODO(synk): exact resample_frames implementation not provided; linear interpolation
    # (align_corners=True style) assumed.
    pos = jnp.linspace(0.0, f0.shape[1] - 1.0, T)
    lo = jnp.floor(pos).astype(jnp.int32)
    hi = jnp.minimum(lo + 1, f0.shape[1] - 1)
    w = pos - lo.astype(jnp.float32)
    f0_rs = f0[:, lo] * (1.0 - w)[None, :] + f0[:, hi] * w[None, :]          # [B, T]
    f0_n = (f0_rs - FMIN) / (FMAX - FMIN)
    f0_col = jnp.transpose(f0_n).reshape(T * BATCH, 1)                       # time-major column

    out_tb = f0mel_fused(frames_tb, f0_col, params)                          # [T*B, 128]
    out_tb = out_tb[:, :OUT_DIM]                                             # drop lane padding
    return out_tb.reshape(T, BATCH, OUT_DIM).transpose(1, 0, 2)              # [B, T, out_dim]


if __name__ == "__main__":
    key = jax.random.PRNGKey(0)
    pkey, akey, fkey = jax.random.split(key, 3)
    params = init_params(pkey)
    audio = jax.random.normal(akey, (BATCH, AUDIO_LEN), jnp.float32)
    f0 = jax.random.uniform(fkey, (BATCH, F0_LEN), jnp.float32, 80.0, 400.0)   # Hz

    out = jax.jit(f0mel_estimator_forward)(audio, f0, params)
    out = jax.block_until_ready(out)

    assert out.shape == (BATCH, N_FRAMES, OUT_DIM), out.shape
    assert out.dtype == jnp.float32
    assert bool(jnp.all(jnp.isfinite(out)))
    assert bool(jnp.all((out >= 0.0) & (out <= 1.0)))
    print("KERNEL_OK")
</pallas_src>

<mosaic_0001>
module attributes {stable_mosaic.version = 11 : i64} {
  func.func @_f0mel_kernel(%arg0: memref<18x64xf32, #tpu.memory_space<vmem>>, %arg1: memref<18x1xf32, #tpu.memory_space<vmem>>, %arg2: memref<64x66xf32, #tpu.memory_space<vmem>>, %arg3: memref<33x16xf32, #tpu.memory_space<vmem>>, %arg4: memref<16x64xf32, #tpu.memory_space<vmem>>, %arg5: memref<1x64xf32, #tpu.memory_space<vmem>>, %arg6: memref<64x32xf32, #tpu.memory_space<vmem>>, %arg7: memref<1x32xf32, #tpu.memory_space<vmem>>, %arg8: memref<32x16xf32, #tpu.memory_space<vmem>>, %arg9: memref<1x16xf32, #tpu.memory_space<vmem>>, %arg10: memref<16x96xf32, #tpu.memory_space<vmem>>, %arg11: memref<1x96xf32, #tpu.memory_space<vmem>>, %arg12: memref<1x96xf32, #tpu.memory_space<vmem>>, %arg13: memref<32x96xf32, #tpu.memory_space<vmem>>, %arg14: memref<1x32xf32, #tpu.memory_space<vmem>>, %arg15: memref<32x128xf32, #tpu.memory_space<vmem>>, %arg16: memref<1x128xf32, #tpu.memory_space<vmem>>, %arg17: memref<18x128xf32, #tpu.memory_space<vmem>>) attributes {dimension_semantics = [], scalar_prefetch = 0 : i64, scratch_operands = 0 : i64, tpu.core_type = #tpu.core_type<tc>} {
    %c0 = arith.constant 0 : index
    %c0_0 = arith.constant 0 : index
    %0 = vector.load %arg0[%c0, %c0_0] : memref<18x64xf32, #tpu.memory_space<vmem>>, vector<18x64xf32>
    %c0_1 = arith.constant 0 : index
    %c0_2 = arith.constant 0 : index
    %1 = vector.load %arg2[%c0_1, %c0_2] : memref<64x66xf32, #tpu.memory_space<vmem>>, vector<64x66xf32>
    %cst = arith.constant dense<0.000000e+00> : vector<18x66xf32>
    %2 = tpu.matmul %0, %1, %cst {dimension_numbers = #tpu.dot_dimension_numbers<[1], [0], [0], [1], [0, 0, 1, 1], [], []>} : vector<18x64xf32>, vector<64x66xf32>, vector<18x66xf32> -> vector<18x66xf32>
    %3 = vector.extract_strided_slice %2 {offsets = [0, 0], sizes = [18, 33], strides = [1, 1]} : vector<18x66xf32> to vector<18x33xf32>
    %4 = vector.extract_strided_slice %2 {offsets = [0, 33], sizes = [18, 33], strides = [1, 1]} : vector<18x66xf32> to vector<18x33xf32>
    %5 = arith.mulf %3, %3 : vector<18x33xf32>
    %6 = arith.mulf %4, %4 : vector<18x33xf32>
    %7 = arith.addf %5, %6 : vector<18x33xf32>
    %8 = math.sqrt %7 : vector<18x33xf32>
    %c0_3 = arith.constant 0 : index
    %c0_4 = arith.constant 0 : index
    %9 = vector.load %arg3[%c0_3, %c0_4] : memref<33x16xf32, #tpu.memory_space<vmem>>, vector<33x16xf32>
    %cst_5 = arith.constant dense<0.000000e+00> : vector<18x16xf32>
    %10 = tpu.matmul %8, %9, %cst_5 {dimension_numbers = #tpu.dot_dimension_numbers<[1], [0], [0], [1], [0, 0, 1, 1], [], []>} : vector<18x33xf32>, vector<33x16xf32>, vector<18x16xf32> -> vector<18x16xf32>
    %cst_6 = arith.constant 9.99999997E-7 : f32
    %11 = vector.broadcast %cst_6 : f32 to vector<18x16xf32>
    %12 = arith.addf %10, %11 : vector<18x16xf32>
    %13 = math.log %12 : vector<18x16xf32>
    %14 = vector.shape_cast %13 : vector<18x16xf32> to vector<1x18x16xf32>
    %cst_7 = arith.constant dense<0.000000e+00> : vector<1xf32>
    %15 = vector.multi_reduction <add>, %14, %cst_7 [1, 2] : vector<1x18x16xf32> to vector<1xf32>
    %16 = vector.shape_cast %15 : vector<1xf32> to vector<1x1x1xf32>
    %17 = vector.extract %16[0, 0, 0] : f32 from vector<1x1x1xf32>
    %18 = arith.mulf %13, %13 : vector<18x16xf32>
    %19 = vector.shape_cast %18 : vector<18x16xf32> to vector<1x18x16xf32>
    %cst_8 = arith.constant dense<0.000000e+00> : vector<1xf32>
    %20 = vector.multi_reduction <add>, %19, %cst_8 [1, 2] : vector<1x18x16xf32> to vector<1xf32>
    %21 = vector.shape_cast %20 : vector<1xf32> to vector<1x1x1xf32>
    %22 = vector.extract %21[0, 0, 0] : f32 from vector<1x1x1xf32>
    %cst_9 = arith.constant 0.00347222225 : f32
    %23 = arith.mulf %17, %cst_9 : f32
    %cst_10 = arith.constant 0.00347222225 : f32
    %24 = arith.mulf %22, %cst_10 : f32
    %25 = arith.mulf %23, %23 : f32
    %26 = arith.subf %24, %25 : f32
    %27 = vector.broadcast %23 : f32 to vector<18x16xf32>
    %28 = arith.subf %13, %27 : vector<18x16xf32>
    %cst_11 = arith.constant 9.99999974E-6 : f32
    %29 = arith.addf %26, %cst_11 : f32
    %30 = math.rsqrt %29 : f32
    %31 = vector.broadcast %30 : f32 to vector<18x16xf32>
    %32 = arith.mulf %28, %31 : vector<18x16xf32>
    %c0_12 = arith.constant 0 : index
    %c0_13 = arith.constant 0 : index
    %33 = vector.load %arg4[%c0_12, %c0_13] : memref<16x64xf32, #tpu.memory_space<vmem>>, vector<16x64xf32>
    %cst_14 = arith.constant dense<0.000000e+00> : vector<18x64xf32>
    %34 = tpu.matmul %32, %33, %cst_14 {dimension_numbers = #tpu.dot_dimension_numbers<[1], [0], [0], [1], [0, 0, 1, 1], [], []>} : vector<18x16xf32>, vector<16x64xf32>, vector<18x64xf32> -> vector<18x64xf32>
    %c0_15 = arith.constant 0 : index
    %c0_16 = arith.constant 0 : index
    %35 = vector.load %arg5[%c0_15, %c0_16] : memref<1x64xf32, #tpu.memory_space<vmem>>, vector<1x64xf32>
    %36 = vector.broadcast %35 : vector<1x64xf32> to vector<18x64xf32>
    %37 = arith.addf %34, %36 : vector<18x64xf32>
    %cst_17 = arith.constant 0.000000e+00 : f32
    %38 = vector.broadcast %cst_17 : f32 to vector<18x64xf32>
    %39 = arith.maximumf %37, %38 : vector<18x64xf32>
    %c0_18 = arith.constant 0 : index
    %c0_19 = arith.constant 0 : index
    %40 = vector.load %arg6[%c0_18, %c0_19] : memref<64x32xf32, #tpu.memory_space<vmem>>, vector<64x32xf32>
    %cst_20 = arith.constant dense<0.000000e+00> : vector<18x32xf32>
    %41 = tpu.matmul %39, %40, %cst_20 {dimension_numbers = #tpu.dot_dimension_numbers<[1], [0], [0], [1], [0, 0, 1, 1], [], []>} : vector<18x64xf32>, vector<64x32xf32>, vector<18x32xf32> -> vector<18x32xf32>
    %c0_21 = arith.constant 0 : index
    %c0_22 = arith.constant 0 : index
    %42 = vector.load %arg7[%c0_21, %c0_22] : memref<1x32xf32, #tpu.memory_space<vmem>>, vector<1x32xf32>
    %43 = vector.broadcast %42 : vector<1x32xf32> to vector<18x32xf32>
    %44 = arith.addf %41, %43 : vector<18x32xf32>
    %cst_23 = arith.constant 0.000000e+00 : f32
    %45 = vector.broadcast %cst_23 : f32 to vector<18x32xf32>
    %46 = arith.maximumf %44, %45 : vector<18x32xf32>
    %c0_24 = arith.constant 0 : index
    %c0_25 = arith.constant 0 : index
    %47 = vector.load %arg8[%c0_24, %c0_25] : memref<32x16xf32, #tpu.memory_space<vmem>>, vector<32x16xf32>
    %cst_26 = arith.constant dense<0.000000e+00> : vector<18x16xf32>
    %48 = tpu.matmul %46, %47, %cst_26 {dimension_numbers = #tpu.dot_dimension_numbers<[1], [0], [0], [1], [0, 0, 1, 1], [], []>} : vector<18x32xf32>, vector<32x16xf32>, vector<18x16xf32> -> vector<18x16xf32>
    %c0_27 = arith.constant 0 : index
    %c0_28 = arith.constant 0 : index
    %49 = vector.load %arg9[%c0_27, %c0_28] : memref<1x16xf32, #tpu.memory_space<vmem>>, vector<1x16xf32>
    %50 = vector.broadcast %49 : vector<1x16xf32> to vector<18x16xf32>
    %51 = arith.addf %48, %50 : vector<18x16xf32>
    %cst_29 = arith.constant 0.000000e+00 : f32
    %52 = vector.broadcast %cst_29 : f32 to vector<18x16xf32>
    %53 = arith.maximumf %51, %52 : vector<18x16xf32>
    %c0_30 = arith.constant 0 : index
    %c0_31 = arith.constant 0 : index
    %54 = vector.load %arg10[%c0_30, %c0_31] : memref<16x96xf32, #tpu.memory_space<vmem>>, vector<16x96xf32>
    %cst_32 = arith.constant dense<0.000000e+00> : vector<18x96xf32>
    %55 = tpu.matmul %53, %54, %cst_32 {dimension_numbers = #tpu.dot_dimension_numbers<[1], [0], [0], [1], [0, 0, 1, 1], [], []>} : vector<18x16xf32>, vector<16x96xf32>, vector<18x96xf32> -> vector<18x96xf32>
    %c0_33 = arith.constant 0 : index
    %c0_34 = arith.constant 0 : index
    %56 = vector.load %arg1[%c0_33, %c0_34] : memref<18x1xf32, #tpu.memory_space<vmem>>, vector<18x1xf32>
    %c0_35 = arith.constant 0 : index
    %c0_36 = arith.constant 0 : index
    %57 = vector.load %arg11[%c0_35, %c0_36] : memref<1x96xf32, #tpu.memory_space<vmem>>, vector<1x96xf32>
    %58 = vector.broadcast %56 : vector<18x1xf32> to vector<18x96xf32>
    %59 = vector.broadcast %57 : vector<1x96xf32> to vector<18x96xf32>
    %60 = arith.mulf %58, %59 : vector<18x96xf32>
    %61 = arith.addf %55, %60 : vector<18x96xf32>
    %c0_37 = arith.constant 0 : index
    %c0_38 = arith.constant 0 : index
    %62 = vector.load %arg12[%c0_37, %c0_38] : memref<1x96xf32, #tpu.memory_space<vmem>>, vector<1x96xf32>
    %63 = vector.broadcast %62 : vector<1x96xf32> to vector<18x96xf32>
    %64 = arith.addf %61, %63 : vector<18x96xf32>
    %c0_39 = arith.constant 0 : index
    %c0_40 = arith.constant 0 : index
    %65 = vector.load %arg13[%c0_39, %c0_40] : memref<32x96xf32, #tpu.memory_space<vmem>>, vector<32x96xf32>
    %c0_41 = arith.constant 0 : index
    %c0_42 = arith.constant 0 : index
    %66 = vector.load %arg14[%c0_41, %c0_42] : memref<1x32xf32, #tpu.memory_space<vmem>>, vector<1x32xf32>
    %67 = vector.shape_cast %66 : vector<1x32xf32> to vector<1x32xf32>
    %68 = vector.broadcast %67 : vector<1x32xf32> to vector<2x32xf32>
    %cst_43 = arith.constant 0.000000e+00 : f32
    %69 = vector.broadcast %cst_43 : f32 to vector<2x32xf32>
    %70 = vector.extract_strided_slice %64 {offsets = [0, 0], sizes = [2, 96], strides = [1, 1]} : vector<18x96xf32> to vector<2x96xf32>
    %cst_44 = arith.constant dense<0.000000e+00> : vector<2x96xf32>
    %71 = tpu.matmul %69, %65, %cst_44 {dimension_numbers = #tpu.dot_dimension_numbers<[1], [0], [0], [1], [0, 0, 1, 1], [], []>} : vector<2x32xf32>, vector<32x96xf32>, vector<2x96xf32> -> vector<2x96xf32>
    %72 = vector.extract_strided_slice %70 {offsets = [0, 0], sizes = [2, 32], strides = [1, 1]} : vector<2x96xf32> to vector<2x32xf32>
    %73 = vector.extract_strided_slice %71 {offsets = [0, 0], sizes = [2, 32], strides = [1, 1]} : vector<2x96xf32> to vector<2x32xf32>
    %74 = arith.addf %72, %73 : vector<2x32xf32>
    %75 = arith.negf %74 : vector<2x32xf32>
    %76 = math.exp %75 : vector<2x32xf32>
    %cst_45 = arith.constant 1.000000e+00 : f32
    %77 = vector.broadcast %cst_45 : f32 to vector<2x32xf32>
    %78 = arith.addf %77, %76 : vector<2x32xf32>
    %79 = arith.divf %77, %78 : vector<2x32xf32>
    %80 = vector.extract_strided_slice %70 {offsets = [0, 32], sizes = [2, 32], strides = [1, 1]} : vector<2x96xf32> to vector<2x32xf32>
    %81 = vector.extract_strided_slice %71 {offsets = [0, 32], sizes = [2, 32], strides = [1, 1]} : vector<2x96xf32> to vector<2x32xf32>
    %82 = arith.addf %80, %81 : vector<2x32xf32>
    %83 = arith.negf %82 : vector<2x32xf32>
    %84 = math.exp %83 : vector<2x32xf32>
    %cst_46 = arith.constant 1.000000e+00 : f32
    %85 = vector.broadcast %cst_46 : f32 to vector<2x32xf32>
    %86 = arith.addf %85, %84 : vector<2x32xf32>
    %87 = arith.divf %85, %86 : vector<2x32xf32>
    %88 = vector.extract_strided_slice %70 {offsets = [0, 64], sizes = [2, 32], strides = [1, 1]} : vector<2x96xf32> to vector<2x32xf32>
    %89 = vector.extract_strided_slice %71 {offsets = [0, 64], sizes = [2, 32], strides = [1, 1]} : vector<2x96xf32> to vector<2x32xf32>
    %90 = arith.addf %89, %68 : vector<2x32xf32>
    %91 = arith.mulf %79, %90 : vector<2x32xf32>
    %92 = arith.addf %88, %91 : vector<2x32xf32>
    %93 = math.tanh %92 : vector<2x32xf32>
    %cst_47 = arith.constant 1.000000e+00 : f32
    %94 = vector.broadcast %cst_47 : f32 to vector<2x32xf32>
    %95 = arith.subf %94, %87 : vector<2x32xf32>
    %96 = arith.mulf %95, %93 : vector<2x32xf32>
    %97 = arith.mulf %87, %69 : vector<2x32xf32>
    %98 = arith.addf %96, %97 : vector<2x32xf32>
    %99 = vector.extract_strided_slice %64 {offsets = [2, 0], sizes = [2, 96], strides = [1, 1]} : vector<18x96xf32> to vector<2x96xf32>
    %cst_48 = arith.constant dense<0.000000e+00> : vector<2x96xf32>
    %100 = tpu.matmul %98, %65, %cst_48 {dimension_numbers = #tpu.dot_dimension_numbers<[1], [0], [0], [1], [0, 0, 1, 1], [], []>} : vector<2x32xf32>, vector<32x96xf32>, vector<2x96xf32> -> vector<2x96xf32>
    %101 = vector.extract_strided_slice %99 {offsets = [0, 0], sizes = [2, 32], strides = [1, 1]} : vector<2x96xf32> to vector<2x32xf32>
    %102 = vector.extract_strided_slice %100 {offsets = [0, 0], sizes = [2, 32], strides = [1, 1]} : vector<2x96xf32> to vector<2x32xf32>
    %103 = arith.addf %101, %102 : vector<2x32xf32>
    %104 = arith.negf %103 : vector<2x32xf32>
    %105 = math.exp %104 : vector<2x32xf32>
    %cst_49 = arith.constant 1.000000e+00 : f32
    %106 = vector.broadcast %cst_49 : f32 to vector<2x32xf32>
    %107 = arith.addf %106, %105 : vector<2x32xf32>
    %108 = arith.divf %106, %107 : vector<2x32xf32>
    %109 = vector.extract_strided_slice %99 {offsets = [0, 32], sizes = [2, 32], strides = [1, 1]} : vector<2x96xf32> to vector<2x32xf32>
    %110 = vector.extract_strided_slice %100 {offsets = [0, 32], sizes = [2, 32], strides = [1, 1]} : vector<2x96xf32> to vector<2x32xf32>
    %111 = arith.addf %109, %110 : vector<2x32xf32>
    %112 = arith.negf %111 : vector<2x32xf32>
    %113 = math.exp %112 : vector<2x32xf32>
    %cst_50 = arith.constant 1.000000e+00 : f32
    %114 = vector.broadcast %cst_50 : f32 to vector<2x32xf32>
    %115 = arith.addf %114, %113 : vector<2x32xf32>
    %116 = arith.divf %114, %115 : vector<2x32xf32>
    %117 = vector.extract_strided_slice %99 {offsets = [0, 64], sizes = [2, 32], strides = [1, 1]} : vector<2x96xf32> to vector<2x32xf32>
    %118 = vector.extract_strided_slice %100 {offsets = [0, 64], sizes = [2, 32], strides = [1, 1]} : vector<2x96xf32> to vector<2x32xf32>
    %119 = arith.addf %118, %68 : vector<2x32xf32>
    %120 = arith.mulf %108, %119 : vector<2x32xf32>
    %121 = arith.addf %117, %120 : vector<2x32xf32>
    %122 = math.tanh %121 : vector<2x32xf32>
    %cst_51 = arith.constant 1.000000e+00 : f32
    %123 = vector.broadcast %cst_51 : f32 to vector<2x32xf32>
    %124 = arith.subf %123, %116 : vector<2x32xf32>
    %125 = arith.mulf %124, %122 : vector<2x32xf32>
    %126 = arith.mulf %116, %98 : vector<2x32xf32>
    %127 = arith.addf %125, %126 : vector<2x32xf32>
    %128 = vector.extract_strided_slice %64 {offsets = [4, 0], sizes = [2, 96], strides = [1, 1]} : vector<18x96xf32> to vector<2x96xf32>
    %cst_52 = arith.constant dense<0.000000e+00> : vector<2x96xf32>
    %129 = tpu.matmul %127, %65, %cst_52 {dimension_numbers = #tpu.dot_dimension_numbers<[1], [0], [0], [1], [0, 0, 1, 1], [], []>} : vector<2x32xf32>, vector<32x96xf32>, vector<2x96xf32> -> vector<2x96xf32>
    %130 = vector.extract_strided_slice %128 {offsets = [0, 0], sizes = [2, 32], strides = [1, 1]} : vector<2x96xf32> to vector<2x32xf32>
    %131 = vector.extract_strided_slice %129 {offsets = [0, 0], sizes = [2, 32], strides = [1, 1]} : vector<2x96xf32> to vector<2x32xf32>
    %132 = arith.addf %130, %131 : vector<2x32xf32>
    %133 = arith.negf %132 : vector<2x32xf32>
    %134 = math.exp %133 : vector<2x32xf32>
    %cst_53 = arith.constant 1.000000e+00 : f32
    %135 = vector.broadcast %cst_53 : f32 to vector<2x32xf32>
    %136 = arith.addf %135, %134 : vector<2x32xf32>
    %137 = arith.divf %135, %136 : vector<2x32xf32>
    %138 = vector.extract_strided_slice %128 {offsets = [0, 32], sizes = [2, 32], strides = [1, 1]} : vector<2x96xf32> to vector<2x32xf32>
    %139 = vector.extract_strided_slice %129 {offsets = [0, 32], sizes = [2, 32], strides = [1, 1]} : vector<2x96xf32> to vector<2x32xf32>
    %140 = arith.addf %138, %139 : vector<2x32xf32>
    %141 = arith.negf %140 : vector<2x32xf32>
    %142 = math.exp %141 : vector<2x32xf32>
    %cst_54 = arith.constant 1.000000e+00 : f32
    %143 = vector.broadcast %cst_54 : f32 to vector<2x32xf32>
    %144 = arith.addf %143, %142 : vector<2x32xf32>
    %145 = arith.divf %143, %144 : vector<2x32xf32>
    %146 = vector.extract_strided_slice %128 {offsets = [0, 64], sizes = [2, 32], strides = [1, 1]} : vector<2x96xf32> to vector<2x32xf32>
    %147 = vector.extract_strided_slice %129 {offsets = [0, 64], sizes = [2, 32], strides = [1, 1]} : vector<2x96xf32> to vector<2x32xf32>
    %148 = arith.addf %147, %68 : vector<2x32xf32>
    %149 = arith.mulf %137, %148 : vector<2x32xf32>
    %150 = arith.addf %146, %149 : vector<2x32xf32>
    %151 = math.tanh %150 : vector<2x32xf32>
    %cst_55 = arith.constant 1.000000e+00 : f32
    %152 = vector.broadcast %cst_55 : f32 to vector<2x32xf32>
    %153 = arith.subf %152, %145 : vector<2x32xf32>
    %154 = arith.mulf %153, %151 : vector<2x32xf32>
    %155 = arith.mulf %145, %127 : vector<2x32xf32>
    %156 = arith.addf %154, %155 : vector<2x32xf32>
    %157 = vector.extract_strided_slice %64 {offsets = [6, 0], sizes = [2, 96], strides = [1, 1]} : vector<18x96xf32> to vector<2x96xf32>
    %cst_56 = arith.constant dense<0.000000e+00> : vector<2x96xf32>
    %158 = tpu.matmul %156, %65, %cst_56 {dimension_numbers = #tpu.dot_dimension_numbers<[1], [0], [0], [1], [0, 0, 1, 1], [], []>} : vector<2x32xf32>, vector<32x96xf32>, vector<2x96xf32> -> vector<2x96xf32>
    %159 = vector.extract_strided_slice %157 {offsets = [0, 0], sizes = [2, 32], strides = [1, 1]} : vector<2x96xf32> to vector<2x32xf32>
    %160 = vector.extract_strided_slice %158 {offsets = [0, 0], sizes = [2, 32], strides = [1, 1]} : vector<2x96xf32> to vector<2x32xf32>
    %161 = arith.addf %159, %160 : vector<2x32xf32>
    %162 = arith.negf %161 : vector<2x32xf32>
    %163 = math.exp %162 : vector<2x32xf32>
    %cst_57 = arith.constant 1.000000e+00 : f32
    %164 = vector.broadcast %cst_57 : f32 to vector<2x32xf32>
    %165 = arith.addf %164, %163 : vector<2x32xf32>
    %166 = arith.divf %164, %165 : vector<2x32xf32>
    %167 = vector.extract_strided_slice %157 {offsets = [0, 32], sizes = [2, 32], strides = [1, 1]} : vector<2x96xf32> to vector<2x32xf32>
    %168 = vector.extract_strided_slice %158 {offsets = [0, 32], sizes = [2, 32], strides = [1, 1]} : vector<2x96xf32> to vector<2x32xf32>
    %169 = arith.addf %167, %168 : vector<2x32xf32>
    %170 = arith.negf %169 : vector<2x32xf32>
    %171 = math.exp %170 : vector<2x32xf32>
    %cst_58 = arith.constant 1.000000e+00 : f32
    %172 = vector.broadcast %cst_58 : f32 to vector<2x32xf32>
    %173 = arith.addf %172, %171 : vector<2x32xf32>
    %174 = arith.divf %172, %173 : vector<2x32xf32>
    %175 = vector.extract_strided_slice %157 {offsets = [0, 64], sizes = [2, 32], strides = [1, 1]} : vector<2x96xf32> to vector<2x32xf32>
    %176 = vector.extract_strided_slice %158 {offsets = [0, 64], sizes = [2, 32], strides = [1, 1]} : vector<2x96xf32> to vector<2x32xf32>
    %177 = arith.addf %176, %68 : vector<2x32xf32>
    %178 = arith.mulf %166, %177 : vector<2x32xf32>
    %179 = arith.addf %175, %178 : vector<2x32xf32>
    %180 = math.tanh %179 : vector<2x32xf32>
    %cst_59 = arith.constant 1.000000e+00 : f32
    %181 = vector.broadcast %cst_59 : f32 to vector<2x32xf32>
    %182 = arith.subf %181, %174 : vector<2x32xf32>
    %183 = arith.mulf %182, %180 : vector<2x32xf32>
    %184 = arith.mulf %174, %156 : vector<2x32xf32>
    %185 = arith.addf %183, %184 : vector<2x32xf32>
    %186 = vector.extract_strided_slice %64 {offsets = [8, 0], sizes = [2, 96], strides = [1, 1]} : vector<18x96xf32> to vector<2x96xf32>
    %cst_60 = arith.constant dense<0.000000e+00> : vector<2x96xf32>
    %187 = tpu.matmul %185, %65, %cst_60 {dimension_numbers = #tpu.dot_dimension_numbers<[1], [0], [0], [1], [0, 0, 1, 1], [], []>} : vector<2x32xf32>, vector<32x96xf32>, vector<2x96xf32> -> vector<2x96xf32>
    %188 = vector.extract_strided_slice %186 {offsets = [0, 0], sizes = [2, 32], strides = [1, 1]} : vector<2x96xf32> to vector<2x32xf32>
    %189 = vector.extract_strided_slice %187 {offsets = [0, 0], sizes = [2, 32], strides = [1, 1]} : vector<2x96xf32> to vector<2x32xf32>
    %190 = arith.addf %188, %189 : vector<2x32xf32>
    %191 = arith.negf %190 : vector<2x32xf32>
    %192 = math.exp %191 : vector<2x32xf32>
    %cst_61 = arith.constant 1.000000e+00 : f32
    %193 = vector.broadcast %cst_61 : f32 to vector<2x32xf32>
    %194 = arith.addf %193, %192 : vector<2x32xf32>
    %195 = arith.divf %193, %194 : vector<2x32xf32>
    %196 = vector.extract_strided_slice %186 {offsets = [0, 32], sizes = [2, 32], strides = [1, 1]} : vector<2x96xf32> to vector<2x32xf32>
    %197 = vector.extract_strided_slice %187 {offsets = [0, 32], sizes = [2, 32], strides = [1, 1]} : vector<2x96xf32> to vector<2x32xf32>
    %198 = arith.addf %196, %197 : vector<2x32xf32>
    %199 = arith.negf %198 : vector<2x32xf32>
    %200 = math.exp %199 : vector<2x32xf32>
    %cst_62 = arith.constant 1.000000e+00 : f32
    %201 = vector.broadcast %cst_62 : f32 to vector<2x32xf32>
    %202 = arith.addf %201, %200 : vector<2x32xf32>
    %203 = arith.divf %201, %202 : vector<2x32xf32>
    %204 = vector.extract_strided_slice %186 {offsets = [0, 64], sizes = [2, 32], strides = [1, 1]} : vector<2x96xf32> to vector<2x32xf32>
    %205 = vector.extract_strided_slice %187 {offsets = [0, 64], sizes = [2, 32], strides = [1, 1]} : vector<2x96xf32> to vector<2x32xf32>
    %206 = arith.addf %205, %68 : vector<2x32xf32>
    %207 = arith.mulf %195, %206 : vector<2x32xf32>
    %208 = arith.addf %204, %207 : vector<2x32xf32>
    %209 = math.tanh %208 : vector<2x32xf32>
    %cst_63 = arith.constant 1.000000e+00 : f32
    %210 = vector.broadcast %cst_63 : f32 to vector<2x32xf32>
    %211 = arith.subf %210, %203 : vector<2x32xf32>
    %212 = arith.mulf %211, %209 : vector<2x32xf32>
    %213 = arith.mulf %203, %185 : vector<2x32xf32>
    %214 = arith.addf %212, %213 : vector<2x32xf32>
    %215 = vector.extract_strided_slice %64 {offsets = [10, 0], sizes = [2, 96], strides = [1, 1]} : vector<18x96xf32> to vector<2x96xf32>
    %cst_64 = arith.constant dense<0.000000e+00> : vector<2x96xf32>
    %216 = tpu.matmul %214, %65, %cst_64 {dimension_numbers = #tpu.dot_dimension_numbers<[1], [0], [0], [1], [0, 0, 1, 1], [], []>} : vector<2x32xf32>, vector<32x96xf32>, vector<2x96xf32> -> vector<2x96xf32>
    %217 = vector.extract_strided_slice %215 {offsets = [0, 0], sizes = [2, 32], strides = [1, 1]} : vector<2x96xf32> to vector<2x32xf32>
    %218 = vector.extract_strided_slice %216 {offsets = [0, 0], sizes = [2, 32], strides = [1, 1]} : vector<2x96xf32> to vector<2x32xf32>
    %219 = arith.addf %217, %218 : vector<2x32xf32>
    %220 = arith.negf %219 : vector<2x32xf32>
    %221 = math.exp %220 : vector<2x32xf32>
    %cst_65 = arith.constant 1.000000e+00 : f32
    %222 = vector.broadcast %cst_65 : f32 to vector<2x32xf32>
    %223 = arith.addf %222, %221 : vector<2x32xf32>
    %224 = arith.divf %222, %223 : vector<2x32xf32>
    %225 = vector.extract_strided_slice %215 {offsets = [0, 32], sizes = [2, 32], strides = [1, 1]} : vector<2x96xf32> to vector<2x32xf32>
    %226 = vector.extract_strided_slice %216 {offsets = [0, 32], sizes = [2, 32], strides = [1, 1]} : vector<2x96xf32> to vector<2x32xf32>
    %227 = arith.addf %225, %226 : vector<2x32xf32>
    %228 = arith.negf %227 : vector<2x32xf32>
    %229 = math.exp %228 : vector<2x32xf32>
    %cst_66 = arith.constant 1.000000e+00 : f32
    %230 = vector.broadcast %cst_66 : f32 to vector<2x32xf32>
    %231 = arith.addf %230, %229 : vector<2x32xf32>
    %232 = arith.divf %230, %231 : vector<2x32xf32>
    %233 = vector.extract_strided_slice %215 {offsets = [0, 64], sizes = [2, 32], strides = [1, 1]} : vector<2x96xf32> to vector<2x32xf32>
    %234 = vector.extract_strided_slice %216 {offsets = [0, 64], sizes = [2, 32], strides = [1, 1]} : vector<2x96xf32> to vector<2x32xf32>
    %235 = arith.addf %234, %68 : vector<2x32xf32>
    %236 = arith.mulf %224, %235 : vector<2x32xf32>
    %237 = arith.addf %233, %236 : vector<2x32xf32>
    %238 = math.tanh %237 : vector<2x32xf32>
    %cst_67 = arith.constant 1.000000e+00 : f32
    %239 = vector.broadcast %cst_67 : f32 to vector<2x32xf32>
    %240 = arith.subf %239, %232 : vector<2x32xf32>
    %241 = arith.mulf %240, %238 : vector<2x32xf32>
    %242 = arith.mulf %232, %214 : vector<2x32xf32>
    %243 = arith.addf %241, %242 : vector<2x32xf32>
    %244 = vector.extract_strided_slice %64 {offsets = [12, 0], sizes = [2, 96], strides = [1, 1]} : vector<18x96xf32> to vector<2x96xf32>
    %cst_68 = arith.constant dense<0.000000e+00> : vector<2x96xf32>
    %245 = tpu.matmul %243, %65, %cst_68 {dimension_numbers = #tpu.dot_dimension_numbers<[1], [0], [0], [1], [0, 0, 1, 1], [], []>} : vector<2x32xf32>, vector<32x96xf32>, vector<2x96xf32> -> vector<2x96xf32>
    %246 = vector.extract_strided_slice %244 {offsets = [0, 0], sizes = [2, 32], strides = [1, 1]} : vector<2x96xf32> to vector<2x32xf32>
    %247 = vector.extract_strided_slice %245 {offsets = [0, 0], sizes = [2, 32], strides = [1, 1]} : vector<2x96xf32> to vector<2x32xf32>
    %248 = arith.addf %246, %247 : vector<2x32xf32>
    %249 = arith.negf %248 : vector<2x32xf32>
    %250 = math.exp %249 : vector<2x32xf32>
    %cst_69 = arith.constant 1.000000e+00 : f32
    %251 = vector.broadcast %cst_69 : f32 to vector<2x32xf32>
    %252 = arith.addf %251, %250 : vector<2x32xf32>
    %253 = arith.divf %251, %252 : vector<2x32xf32>
    %254 = vector.extract_strided_slice %244 {offsets = [0, 32], sizes = [2, 32], strides = [1, 1]} : vector<2x96xf32> to vector<2x32xf32>
    %255 = vector.extract_strided_slice %245 {offsets = [0, 32], sizes = [2, 32], strides = [1, 1]} : vector<2x96xf32> to vector<2x32xf32>
    %256 = arith.addf %254, %255 : vector<2x32xf32>
    %257 = arith.negf %256 : vector<2x32xf32>
    %258 = math.exp %257 : vector<2x32xf32>
    %cst_70 = arith.constant 1.000000e+00 : f32
    %259 = vector.broadcast %cst_70 : f32 to vector<2x32xf32>
    %260 = arith.addf %259, %258 : vector<2x32xf32>
    %261 = arith.divf %259, %260 : vector<2x32xf32>
    %262 = vector.extract_strided_slice %244 {offsets = [0, 64], sizes = [2, 32], strides = [1, 1]} : vector<2x96xf32> to vector<2x32xf32>
    %263 = vector.extract_strided_slice %245 {offsets = [0, 64], sizes = [2, 32], strides = [1, 1]} : vector<2x96xf32> to vector<2x32xf32>
    %264 = arith.addf %263, %68 : vector<2x32xf32>
    %265 = arith.mulf %253, %264 : vector<2x32xf32>
    %266 = arith.addf %262, %265 : vector<2x32xf32>
    %267 = math.tanh %266 : vector<2x32xf32>
    %cst_71 = arith.constant 1.000000e+00 : f32
    %268 = vector.broadcast %cst_71 : f32 to vector<2x32xf32>
    %269 = arith.subf %268, %261 : vector<2x32xf32>
    %270 = arith.mulf %269, %267 : vector<2x32xf32>
    %271 = arith.mulf %261, %243 : vector<2x32xf32>
    %272 = arith.addf %270, %271 : vector<2x32xf32>
    %273 = vector.extract_strided_slice %64 {offsets = [14, 0], sizes = [2, 96], strides = [1, 1]} : vector<18x96xf32> to vector<2x96xf32>
    %cst_72 = arith.constant dense<0.000000e+00> : vector<2x96xf32>
    %274 = tpu.matmul %272, %65, %cst_72 {dimension_numbers = #tpu.dot_dimension_numbers<[1], [0], [0], [1], [0, 0, 1, 1], [], []>} : vector<2x32xf32>, vector<32x96xf32>, vector<2x96xf32> -> vector<2x96xf32>
    %275 = vector.extract_strided_slice %273 {offsets = [0, 0], sizes = [2, 32], strides = [1, 1]} : vector<2x96xf32> to vector<2x32xf32>
    %276 = vector.extract_strided_slice %274 {offsets = [0, 0], sizes = [2, 32], strides = [1, 1]} : vector<2x96xf32> to vector<2x32xf32>
    %277 = arith.addf %275, %276 : vector<2x32xf32>
    %278 = arith.negf %277 : vector<2x32xf32>
    %279 = math.exp %278 : vector<2x32xf32>
    %cst_73 = arith.constant 1.000000e+00 : f32
    %280 = vector.broadcast %cst_73 : f32 to vector<2x32xf32>
    %281 = arith.addf %280, %279 : vector<2x32xf32>
    %282 = arith.divf %280, %281 : vector<2x32xf32>
    %283 = vector.extract_strided_slice %273 {offsets = [0, 32], sizes = [2, 32], strides = [1, 1]} : vector<2x96xf32> to vector<2x32xf32>
    %284 = vector.extract_strided_slice %274 {offsets = [0, 32], sizes = [2, 32], strides = [1, 1]} : vector<2x96xf32> to vector<2x32xf32>
    %285 = arith.addf %283, %284 : vector<2x32xf32>
    %286 = arith.negf %285 : vector<2x32xf32>
    %287 = math.exp %286 : vector<2x32xf32>
    %cst_74 = arith.constant 1.000000e+00 : f32
    %288 = vector.broadcast %cst_74 : f32 to vector<2x32xf32>
    %289 = arith.addf %288, %287 : vector<2x32xf32>
    %290 = arith.divf %288, %289 : vector<2x32xf32>
    %291 = vector.extract_strided_slice %273 {offsets = [0, 64], sizes = [2, 32], strides = [1, 1]} : vector<2x96xf32> to vector<2x32xf32>
    %292 = vector.extract_strided_slice %274 {offsets = [0, 64], sizes = [2, 32], strides = [1, 1]} : vector<2x96xf32> to vector<2x32xf32>
    %293 = arith.addf %292, %68 : vector<2x32xf32>
    %294 = arith.mulf %282, %293 : vector<2x32xf32>
    %295 = arith.addf %291, %294 : vector<2x32xf32>
    %296 = math.tanh %295 : vector<2x32xf32>
    %cst_75 = arith.constant 1.000000e+00 : f32
    %297 = vector.broadcast %cst_75 : f32 to vector<2x32xf32>
    %298 = arith.subf %297, %290 : vector<2x32xf32>
    %299 = arith.mulf %298, %296 : vector<2x32xf32>
    %300 = arith.mulf %290, %272 : vector<2x32xf32>
    %301 = arith.addf %299, %300 : vector<2x32xf32>
    %302 = vector.extract_strided_slice %64 {offsets = [16, 0], sizes = [2, 96], strides = [1, 1]} : vector<18x96xf32> to vector<2x96xf32>
    %cst_76 = arith.constant dense<0.000000e+00> : vector<2x96xf32>
    %303 = tpu.matmul %301, %65, %cst_76 {dimension_numbers = #tpu.dot_dimension_numbers<[1], [0], [0], [1], [0, 0, 1, 1], [], []>} : vector<2x32xf32>, vector<32x96xf32>, vector<2x96xf32> -> vector<2x96xf32>
    %304 = vector.extract_strided_slice %302 {offsets = [0, 0], sizes = [2, 32], strides = [1, 1]} : vector<2x96xf32> to vector<2x32xf32>
    %305 = vector.extract_strided_slice %303 {offsets = [0, 0], sizes = [2, 32], strides = [1, 1]} : vector<2x96xf32> to vector<2x32xf32>
    %306 = arith.addf %304, %305 : vector<2x32xf32>
    %307 = arith.negf %306 : vector<2x32xf32>
    %308 = math.exp %307 : vector<2x32xf32>
    %cst_77 = arith.constant 1.000000e+00 : f32
    %309 = vector.broadcast %cst_77 : f32 to vector<2x32xf32>
    %310 = arith.addf %309, %308 : vector<2x32xf32>
    %311 = arith.divf %309, %310 : vector<2x32xf32>
    %312 = vector.extract_strided_slice %302 {offsets = [0, 32], sizes = [2, 32], strides = [1, 1]} : vector<2x96xf32> to vector<2x32xf32>
    %313 = vector.extract_strided_slice %303 {offsets = [0, 32], sizes = [2, 32], strides = [1, 1]} : vector<2x96xf32> to vector<2x32xf32>
    %314 = arith.addf %312, %313 : vector<2x32xf32>
    %315 = arith.negf %314 : vector<2x32xf32>
    %316 = math.exp %315 : vector<2x32xf32>
    %cst_78 = arith.constant 1.000000e+00 : f32
    %317 = vector.broadcast %cst_78 : f32 to vector<2x32xf32>
    %318 = arith.addf %317, %316 : vector<2x32xf32>
    %319 = arith.divf %317, %318 : vector<2x32xf32>
    %320 = vector.extract_strided_slice %302 {offsets = [0, 64], sizes = [2, 32], strides = [1, 1]} : vector<2x96xf32> to vector<2x32xf32>
    %321 = vector.extract_strided_slice %303 {offsets = [0, 64], sizes = [2, 32], strides = [1, 1]} : vector<2x96xf32> to vector<2x32xf32>
    %322 = arith.addf %321, %68 : vector<2x32xf32>
    %323 = arith.mulf %311, %322 : vector<2x32xf32>
    %324 = arith.addf %320, %323 : vector<2x32xf32>
    %325 = math.tanh %324 : vector<2x32xf32>
    %cst_79 = arith.constant 1.000000e+00 : f32
    %326 = vector.broadcast %cst_79 : f32 to vector<2x32xf32>
    %327 = arith.subf %326, %319 : vector<2x32xf32>
    %328 = arith.mulf %327, %325 : vector<2x32xf32>
    %329 = arith.mulf %319, %301 : vector<2x32xf32>
    %330 = arith.addf %328, %329 : vector<2x32xf32>
    %331 = tpu.concatenate %98, %127, %156, %185, %214, %243, %272, %301, %330 in 0 : vector<2x32xf32>, vector<2x32xf32>, vector<2x32xf32>, vector<2x32xf32>, vector<2x32xf32>, vector<2x32xf32>, vector<2x32xf32>, vector<2x32xf32>, vector<2x32xf32> -> vector<18x32xf32>
    %c0_80 = arith.constant 0 : index
    %c0_81 = arith.constant 0 : index
    %332 = vector.load %arg15[%c0_80, %c0_81] : memref<32x128xf32, #tpu.memory_space<vmem>>, vector<32x128xf32>
    %cst_82 = arith.constant dense<0.000000e+00> : vector<18x128xf32>
    %333 = tpu.matmul %331, %332, %cst_82 {dimension_numbers = #tpu.dot_dimension_numbers<[1], [0], [0], [1], [0, 0, 1, 1], [], []>} : vector<18x32xf32>, vector<32x128xf32>, vector<18x128xf32> -> vector<18x128xf32>
    %c0_83 = arith.constant 0 : index
    %c0_84 = arith.constant 0 : index
    %334 = vector.load %arg16[%c0_83, %c0_84] : memref<1x128xf32, #tpu.memory_space<vmem>>, vector<1x128xf32>
    %335 = vector.broadcast %334 : vector<1x128xf32> to vector<18x128xf32>
    %336 = arith.addf %333, %335 : vector<18x128xf32>
    %337 = arith.negf %336 : vector<18x128xf32>
    %338 = math.exp %337 : vector<18x128xf32>
    %cst_85 = arith.constant 1.000000e+00 : f32
    %339 = vector.broadcast %cst_85 : f32 to vector<18x128xf32>
    %340 = arith.addf %339, %338 : vector<18x128xf32>
    %341 = arith.divf %339, %340 : vector<18x128xf32>
    %c0_86 = arith.constant 0 : index
    %c0_87 = arith.constant 0 : index
    %342 = vector.load %arg17[%c0_86, %c0_87] : memref<18x128xf32, #tpu.memory_space<vmem>>, vector<18x128xf32>
    tpu.vector_store %arg17[%c0_86, %c0_87], %341 {strides = array<i32>} : memref<18x128xf32, #tpu.memory_space<vmem>>, vector<18x128xf32>,
    return
  }
}

</mosaic_0001>

<bundles_post_ra>
// kernel: f0mel_estimator_forward.1
= control target key start
LH: loop header
LB: loop body
LE: loop exit
PB: predicated region body
PF: predicated region fallthrough
CT: control target
= control target key end

     0   :  { %vm67_vm0 = vcmask 523264   ;;  %vm172_vm1 = vcmask 1040384   ;;  %vm162_vm3 = vcmask 269312   ;;  %vm208_vm9 = vcmask 130048   ;;  %s1855_s2 = inlined_call_operand.vmem [shape: f32[64,66], index: 2, kind: input, shape index: {}]   ;;  %s1856_s0 = inlined_call_operand.vmem [shape: f32[18,64], index: 0, kind: input, shape index: {}]   ;;  %s1857_s3 = inlined_call_operand.vmem [shape: f32[33,16], index: 3, kind: input, shape index: {}]   ;;  %s1858_s5 = inlined_call_operand.vmem [shape: f32[1,64], index: 5, kind: input, shape index: {}]   ;;  %s1859_s4 = inlined_call_operand.vmem [shape: f32[16,64], index: 4, kind: input, shape index: {}]   ;;  %s1860_s6 = inlined_call_operand.vmem [shape: f32[64,32], index: 6, kind: input, shape index: {}]   ;;  %s1861_s7 = inlined_call_operand.vmem [shape: f32[1,32], index: 7, kind: input, shape index: {}]   ;;  %s1862_s8 = inlined_call_operand.vmem [shape: f32[32,16], index: 8, kind: input, shape index: {}]   ;;  %s1863_s14 = inlined_call_operand.vmem [shape: f32[1,32], index: 14, kind: input, shape index: {}]   ;;  %s1864_s9 = inlined_call_operand.vmem [shape: f32[1,16], index: 9, kind: input, shape index: {}]   ;;  %s1865_s13 = inlined_call_operand.vmem [shape: f32[32,96], index: 13, kind: input, shape index: {}]   ;;  %s1866_s10 = inlined_call_operand.vmem [shape: f32[16,96], index: 10, kind: input, shape index: {}]   ;;  %s1867_s11 = inlined_call_operand.vmem [shape: f32[1,96], index: 11, kind: input, shape index: {}]   ;;  %s1868_s12 = inlined_call_operand.vmem [shape: f32[1,96], index: 12, kind: input, shape index: {}]   ;;  %s1869_s1 = inlined_call_operand.vmem [shape: f32[18,1], index: 1, kind: input, shape index: {}]   ;;  %s1870_s15 = inlined_call_operand.vmem [shape: f32[32,128], index: 15, kind: input, shape index: {}]   ;;  %s1871_s16 = inlined_call_operand.vmem [shape: f32[1,128], index: 16, kind: input, shape index: {}]   ;;  %s1872_s17 = inlined_call_operand.vmem [shape: f32[18,128], index: 17, kind: output, shape index: {}]  }
   0x1   :  { %1875 = sst [smem:[#allocation2_spill]] %s1855_s2  ;;  %v161_v17 = vld [vmem:[%s1857_s3 + $0x20] sm:$0x1]  ;;  %v160_v18 = vld [vmem:[%s1857_s3 + $0x18] sm:$0xff]  ;;  %v159_v19 = vld [vmem:[%s1857_s3 + $0x10] sm:$0xff]  ;;  %vm212_vm10 = vcmask 123904  }
   0x2   :  { %1876 = sst [smem:[#allocation3_spill]] %s1856_s0  ;;  %1238 = vmatpush.msk.msra.mxu1 %vm172_vm1, %v161_v17  ;;  %v158_v20 = vld [vmem:[%s1857_s3 + $0x8] sm:$0xff]  ;;  %v157_v21 = vld [vmem:[%s1857_s3] sm:$0xff]  ;;  %vm368_vm14 = vcmask 261120  }
   0x3   :  { %s1877_s26 = sld [smem:[#allocation2_spill]] }
   0x4   :  { %s1878_s29 = sld [smem:[#allocation3_spill]]  ;;  %188 = vmatpush.msra.mxu1 %v160_v18 }
   0x6   :  { %189 = vmatpush.msra.mxu1 %v159_v19 }
   0x8   :  { %190 = vmatpush.msra.mxu1 %v158_v20 }
   0x9   :  { %v66_v0 = vld [vmem:[%s1877_s26 + $0x38] sm:$0xff]  ;;  %v65_v1 = vld [vmem:[%s1877_s26 + $0x30] sm:$0xff]  ;;  %v64_v2 = vld [vmem:[%s1877_s26 + $0x28] sm:$0xff] }
   0xa   :  { %85 = vmatpush.msra.mxu0 %v66_v0  ;;  %1277 = vmatpush.msra.mxu3 %v66_v0  ;;  %v63_v3 = vld [vmem:[%s1877_s26 + $0x20] sm:$0xff]  ;;  %v62_v4 = vld [vmem:[%s1877_s26 + $0x18] sm:$0xff]  ;;  %v61_v5 = vld [vmem:[%s1877_s26 + $0x10] sm:$0xff] }
   0xb   :  { %v60_v6 = vld [vmem:[%s1877_s26 + $0x8] sm:$0xff]  ;;  %v59_v7 = vld [vmem:[%s1877_s26] sm:$0xff]  ;;  %v58_v10 = vld [vmem:[%s1878_s29 + $0x10] sm:$0x3]  ;;  %s1394_s26 = smov 95   ;;  %191 = vmatpush.msra.mxu1 %v157_v21 }
   0xc   :  { %86 = vmatpush.msra.mxu0 %v65_v1  ;;  %1278 = vmatpush.msra.mxu3 %v65_v1  ;;  %v56_v8 = vld [vmem:[%s1878_s29] sm:$0xff]  ;;  %v57_v9 = vld [vmem:[%s1878_s29 + $0x8] sm:$0xff] }
   0xe   :  { %87 = vmatpush.msra.mxu0 %v64_v2  ;;  %1279 = vmatpush.msra.mxu3 %v64_v2 }
  0x10   :  { %88 = vmatpush.msra.mxu0 %v63_v3  ;;  %1280 = vmatpush.msra.mxu3 %v63_v3 }
  0x12   :  { %89 = vmatpush.msra.mxu0 %v62_v4  ;;  %1281 = vmatpush.msra.mxu3 %v62_v4 }
  0x14   :  { %90 = vmatpush.msra.mxu0 %v61_v5  ;;  %1282 = vmatpush.msra.mxu3 %v61_v5 }
  0x16   :  { %91 = vmatpush.msra.mxu0 %v60_v6  ;;  %1283 = vmatpush.msra.mxu3 %v60_v6 }
  0x18   :  { %92 = vmatpush.msra.mxu0 %v59_v7  ;;  %1284 = vmatpush.msra.mxu3 %v59_v7 }
  0x19   :  { %1235 = vmatmul.msk.f32.vlgmr.msra.gmra.mxu0 %vm67_vm0, %v56_v8  ;;  %1236 = vmatmul.msk.f32.vlgmr.msra.gmra.mxu3 %vm67_vm0, %v57_v9 }
  0x21   :  { %1237 = vmatmul.msk.f32.gmra.mxu3 %vm67_vm0, %v58_v10 }
  0x96   :  { %v94_v11 = vpop.f32.mrf.mxu0 }
  0x97   :  { %v103_v12 = vmul.f32 %v94_v11, %v94_v11 }
  0x99   :  { %109 = vrot.lane.b32.xlu0 %v103_v12, %s1394_s26 }
  0x9c   :  { %v97_v13 = vpop.f32.mrf.mxu3 }
  0x9d   :  { %v104_v14 = vmul.f32 %v97_v13, %v97_v13 }
  0xa1   :  { %111 = vrot.lane.b32.xlu0 %v104_v14, %s1394_s26 }
  0xa4   :  { %v100_v15 = vpop.f32.mrf.mxu3 }
  0xa5   :  { %v105_v16 = vmul.f32 %v100_v15, %v100_v15 }
  0xa7   :  { %113 = vrot.lane.b32.xlu1 %v105_v16, %s1394_s26 }
 0x10b   :  { %v110_v22 = vpop.permute.xlu0 %109 }
 0x10c   :  { %v118_v23 = vadd.f32 %v110_v22, %v103_v12 }
 0x10e   :  { %1314 = vrsqrt.f32 %v118_v23  ;;  %vm128_vm2 = vcmp.eq.f32.partialorder %v118_v23, inf  ;;  %v131_v38 = vand.u32 2147483648, %v118_v23  ;;  %vm130_vm4 = vcmp.eq.f32.partialorder %v118_v23, 0.0 }
 0x113   :  { %v112_v24 = vpop.permute.xlu0 %111 }
 0x114   :  { %v1315_v25 = vpop.eup %1314  ;;  %v119_v26 = vadd.f32 %v112_v24, %v104_v14 }
 0x115   :  { %v122_v27 = vmul.f32 %v1315_v25, %v118_v23 }
 0x116   :  { %1316 = vrsqrt.f32 %v119_v26  ;;  %vm140_vm5 = vcmp.eq.f32.partialorder %v119_v26, inf  ;;  %v143_v49 = vand.u32 2147483648, %v119_v26  ;;  %vm142_vm6 = vcmp.eq.f32.partialorder %v119_v26, 0.0 }
 0x117   :  { %v123_v28 = vmul.f32 %v1315_v25, %v122_v27 }
 0x119   :  { %v114_v29 = vpop.permute.xlu1 %113  ;;  %v124_v30 = vmul.f32 0.5, %v123_v28 }
 0x11a   :  { %v120_v31 = vadd.f32 %v114_v29, %v105_v16 }
 0x11b   :  { %v125_v32 = vsub.f32 1.5, %v124_v30 }
 0x11c   :  { %v1317_v33 = vpop.eup %1316  ;;  %1318 = vrsqrt.f32 %v120_v31  ;;  %vm152_vm7 = vcmp.eq.f32.partialorder %v120_v31, inf  ;;  %v155_v56 = vand.u32 2147483648, %v120_v31  ;;  %vm154_vm8 = vcmp.eq.f32.partialorder %v120_v31, 0.0 }
 0x11d   :  { %v126_v34 = vmul.f32 %v1315_v25, %v125_v32  ;;  %v134_v35 = vmul.f32 %v1317_v33, %v119_v26 }
 0x11f   :  { %v127_v36 = vmul.f32 %v126_v34, %v118_v23  ;;  %v135_v37 = vmul.f32 %v1317_v33, %v134_v35 }
 0x121   :  { %v129_v39 = vsel %vm128_vm2, %v118_v23, %v127_v36  ;;  %v136_v40 = vmul.f32 0.5, %v135_v37 }
 0x122   :  { %v1319_v41 = vpop.eup %1318  ;;  %v132_v42 = vsel %vm130_vm4, %v131_v38, %v129_v39 }
 0x123   :  { %1239 = vmatmul.msk.f32.vlgmr.msra.gmra.mxu1 %vm162_vm3, %v132_v42  ;;  %v137_v43 = vsub.f32 1.5, %v136_v40  ;;  %v146_v44 = vmul.f32 %v1319_v41, %v120_v31  ;;  %v266_v42 = vld [vmem:[%s1859_s4] sm:$0xff] }
 0x125   :  { %v138_v45 = vmul.f32 %v1317_v33, %v137_v43  ;;  %v147_v46 = vmul.f32 %v1319_v41, %v146_v44  ;;  %v317_v43 = vld [vmem:[%s1860_s6 + $0x38] sm:$0xff]  ;;  %v316_v44 = vld [vmem:[%s1860_s6 + $0x30] sm:$0xff] }
 0x126   :  { %339 = vmatpush.msrb.mxu1 %v317_v43  ;;  %1285 = vmatpush.msrb.mxu3 %v317_v43 }
 0x127   :  { %v139_v47 = vmul.f32 %v138_v45, %v119_v26  ;;  %v148_v48 = vmul.f32 0.5, %v147_v46  ;;  %v315_v45 = vld [vmem:[%s1860_s6 + $0x28] sm:$0xff]  ;;  %v314_v46 = vld [vmem:[%s1860_s6 + $0x20] sm:$0xff] }
 0x128   :  { %340 = vmatpush.msrb.mxu1 %v316_v44  ;;  %1286 = vmatpush.msrb.mxu3 %v316_v44 }
 0x129   :  { %v141_v50 = vsel %vm140_vm5, %v119_v26, %v139_v47  ;;  %v149_v51 = vsub.f32 1.5, %v148_v48  ;;  %v313_v47 = vld [vmem:[%s1860_s6 + $0x18] sm:$0xff]  ;;  %v312_v48 = vld [vmem:[%s1860_s6 + $0x10] sm:$0xff] }
 0x12a   :  { %v144_v52 = vsel %vm142_vm6, %v143_v49, %v141_v50  ;;  %341 = vmatpush.msrb.mxu1 %v315_v45  ;;  %1287 = vmatpush.msrb.mxu3 %v315_v45  ;;  %v311_v50 = vld [vmem:[%s1860_s6 + $0x8] sm:$0xff]  ;;  %v1711_v45 = vld [vmem:[%s1868_s12] ss:$0 sm:$0xff] }
 0x12b   :  { %1240 = vmatmul.msk.f32.gmra.mxu1 %vm162_vm3, %v144_v52  ;;  %v150_v53 = vmul.f32 %v1319_v41, %v149_v51  ;;  %v267_v41 = vld [vmem:[%s1859_s4 + $0x8] sm:$0xff] }
 0x12c   :  { %295 = vmatpush.msra.mxu2 %v267_v41  ;;  %342 = vmatpush.msrb.mxu1 %v314_v46 }
 0x12d   :  { %v151_v54 = vmul.f32 %v150_v53, %v120_v31  ;;  %1288 = vmatpush.msrb.mxu3 %v314_v46 }
 0x12e   :  { %296 = vmatpush.msra.mxu2 %v266_v42  ;;  %343 = vmatpush.msrb.mxu1 %v313_v47  ;;  %v1705_v42 = vld [vmem:[%s1867_s11] ss:$0 sm:$0xff]  ;;  %s1398_s11 = smov 96  }
 0x12f   :  { %v153_v55 = vsel %vm152_vm7, %v120_v31, %v151_v54  ;;  %1289 = vmatpush.msrb.mxu3 %v313_v47 }
 0x130   :  { %v156_v57 = vsel %vm154_vm8, %v155_v56, %v153_v55  ;;  %344 = vmatpush.msrb.mxu1 %v312_v48 }
 0x131   :  { %1290 = vmatpush.msrb.mxu3 %v312_v48 }
 0x132   :  { %345 = vmatpush.msrb.mxu1 %v311_v50 }
 0x133   :  { %1241 = vmatmul.msk.f32.gmra.mxu1 %vm162_vm3, %v156_v57  ;;  %1291 = vmatpush.msrb.mxu3 %v311_v50 }
 0x1a0   :  { %v193_v58 = vpop.f32.mrf.mxu1 }
 0x1a1   :  { %v194_v59 = vadd.f32 1e-06, %v193_v58  ;;  %v310_v58 = vld [vmem:[%s1860_s6] sm:$0xff] }
 0x1a2   :  { %346 = vmatpush.msrb.mxu1 %v310_v58  ;;  %1292 = vmatpush.msrb.mxu3 %v310_v58 }
 0x1a3   :  { %1320 = vlog2.f32 %v194_v59  ;;  %v363_v59 = vld [vmem:[%s1862_s8 + $0x18] sm:$0xff] }
 0x1a4   :  { %390 = vmatpush.msrb.mxu2 %v363_v59 }
 0x1a8   :  { %v196_v60 = vpop.f32.mrf.mxu1 }
 0x1a9   :  { %v197_v61 = vadd.f32 1e-06, %v196_v60  ;;  %v1321_v62 = vpop.eup %1320  ;;  %v362_v60 = vld [vmem:[%s1862_s8 + $0x10] sm:$0xff] }
 0x1aa   :  { %v1545_v3 = vmul.f32 0.6931472, %v1321_v62  ;;  %391 = vmatpush.msrb.mxu2 %v362_v60  ;;  %v360_v62 = vld [vmem:[%s1862_s8] sm:$0xff] }
 0x1ab   :  { %1322 = vlog2.f32 %v197_v61  ;;  %v361_v61 = vld [vmem:[%s1862_s8 + $0x8] sm:$0xff] }
 0x1ac   :  { %v224_v6 = vmul.f32 %v1545_v3, %v1545_v3  ;;  %v209_v9 = vsel %vm208_vm9, %v1545_v3, 0.0  ;;  %392 = vmatpush.msrb.mxu2 %v361_v61 }
 0x1ae   :  { %v227_v14 = vsel %vm208_vm9, %v224_v6, 0.0  ;;  %393 = vmatpush.msrb.mxu2 %v360_v62 }
 0x1b0   :  { %v199_v63 = vpop.f32.mrf.mxu1 }
 0x1b1   :  { %v1323_v0 = vpop.eup %1322  ;;  %v200_v1 = vadd.f32 1e-06, %v199_v63  ;;  %v1307_v63 = vld [vmem:[%s1858_s5] ss:$0 sm:$0xff] }
 0x1b2   :  { %v1543_v2 = vmul.f32 0.6931472, %v1323_v0 }
 0x1b3   :  { %1324 = vlog2.f32 %v200_v1 }
 0x1b4   :  { %v225_v4 = vmul.f32 %v1543_v2, %v1543_v2  ;;  %v210_v5 = vsel %vm208_vm9, %v1543_v2, 0.0 }
 0x1b5   :  { %v211_v11 = vadd.f32 %v210_v5, %v209_v9  ;;  %v1624_v9 = vld [vmem:[%s1865_s13 + $0x18] sm:$0xff] }
 0x1b6   :  { %v228_v10 = vsel %vm208_vm9, %v225_v4, 0.0  ;;  %498 = vmatpush.msrb.mxu0 %v1624_v9  ;;  %566 = vmatpush.msra.mxu3 %v1624_v9 }
 0x1b7   :  { %v229_v16 = vadd.f32 %v228_v10, %v227_v14  ;;  %v1629_v10 = vld [vmem:[%s1865_s13 + $0x10] sm:$0xff]  ;;  %v1645_v14 = vld [vmem:[%s1865_s13 + $0x8] sm:$0xff] }
 0x1b8   :  { %499 = vmatpush.msrb.mxu0 %v1629_v10  ;;  %567 = vmatpush.msra.mxu3 %v1629_v10 }
 0x1b9   :  { %v1325_v7 = vpop.eup %1324 }
 0x1ba   :  { %v1553_v8 = vmul.f32 0.6931472, %v1325_v7  ;;  %500 = vmatpush.msrb.mxu0 %v1645_v14  ;;  %568 = vmatpush.msra.mxu3 %v1645_v14 }
 0x1bc   :  { %v213_v12 = vsel %vm212_vm10, %v1553_v8, 0.0  ;;  %v226_v13 = vmul.f32 %v1553_v8, %v1553_v8 }
 0x1bd   :  { %v214_v15 = vadd.f32 %v213_v12, %v211_v11  ;;  %v1309_v11 = vld [vmem:[%s1863_s14] ss:$0 sm:$0xff]  ;;  %v408_v12 = vld [vmem:[%s1866_s10 + $0x8] sm:$0xff]  ;;  %s1395_s14 = smov 64  }
 0x1be   :  { %v230_v17 = vsel %vm212_vm10, %v226_v13, 0.0  ;;  %v1308_v13 = vld [vmem:[%s1861_s7] ss:$0 sm:$0xff]  ;;  %457 = vmatpush.msra.mxu1 %v408_v12 }
 0x1bf   :  { %215 = vadd.xlane.f32.xlu1 %v214_v15  ;;  %v231_v18 = vadd.f32 %v230_v17, %v229_v16  ;;  %v1653_v15 = vld [vmem:[%s1865_s13] sm:$0xff] }
 0x1c0   :  { %501 = vmatpush.msrb.mxu0 %v1653_v15  ;;  %569 = vmatpush.msra.mxu3 %v1653_v15 }
 0x1c1   :  { %232 = vadd.xlane.f32.xlu2 %v231_v18 }
 0x1c2   :  { %638 = vmatpush.msra.mxu0 %v1624_v9 }
 0x1c4   :  { %639 = vmatpush.msra.mxu0 %v1629_v10 }
 0x1c6   :  { %640 = vmatpush.msra.mxu0 %v1645_v14 }
 0x1c8   :  { %641 = vmatpush.msra.mxu0 %v1653_v15 }
 0x1d9   :  { %526 = vrot.lane.b32.xlu2 %v1309_v11, %s1395_s14 }
 0x232   :  { %v216_v19 = vpop.xlane.xlu1 %215 }
 0x233   :  { %v217_v20 = vrot.slane %v216_v19, 4 }
 0x234   :  { %v233_v21 = vpop.xlane.xlu2 %232 }
 0x235   :  { %v218_v22 = vadd.f32 %v217_v20, %v216_v19  ;;  %v234_v23 = vrot.slane %v233_v21, 4  ;;  %v1396_v19 = vmov 0.0  }
 0x236   :  { %502 = vmatmul.f32.vlgmr.msrb.gmra.mxu0 %v1396_v19 }
 0x237   :  { %v219_v24 = vrot.slane %v218_v22, 2  ;;  %v235_v25 = vadd.f32 %v234_v23, %v233_v21  ;;  %848 = vmatpush.msrb.mxu0 %v1624_v9 }
 0x239   :  { %v236_v26 = vrot.slane %v235_v25, 2  ;;  %v220_v27 = vadd.f32 %v219_v24, %v218_v22  ;;  %849 = vmatpush.msrb.mxu0 %v1629_v10 }
 0x23b   :  { %v221_v28 = vrot.slane %v220_v27, 1  ;;  %v237_v29 = vadd.f32 %v236_v26, %v235_v25  ;;  %850 = vmatpush.msrb.mxu0 %v1645_v14  ;;  %v407_v26 = vld [vmem:[%s1866_s10] sm:$0xff] }
 0x23c   :  { %458 = vmatpush.msra.mxu1 %v407_v26 }
 0x23d   :  { %v222_v30 = vadd.f32 %v221_v28, %v220_v27  ;;  %v238_v31 = vrot.slane %v237_v29, 1  ;;  %851 = vmatpush.msrb.mxu0 %v1653_v15  ;;  %v409_v27 = vld [vmem:[%s1869_s1] sm:$0xff]  ;;  %v1397_v28 = vmov 0  }
 0x23e   :  { %1304 = vset.pattern.permute.xlu0 %v1397_v28  ;;  %1305 = vset.pattern.permute.xlu1 %v1397_v28 }
 0x23f   :  { %1293 = vpush %v222_v30  ;;  %v239_v32 = vadd.f32 %v238_v31, %v237_v29  ;;  %415 = vperm.xlu0 %1304, %v409_v27   ;;  %1306 = vset.pattern.permute.xlu2 %v1397_v28  ;;  %v1692_v30 = vpop.permute.xlu2 %526 }
 0x241   :  { %1295 = vpush %v239_v32  ;;  %v1310_v32 = vld [vmem:[%s1864_s9] ss:$0 sm:$0xff] }
 0x270   :  { %s1294_s3 = spop %1293 }
 0x271   :  { %s1562_s2 = smul.f32 0.0034722222, %s1294_s3 }
 0x272   :  { %s1296_s30 = spop %1295 }
 0x273   :  { %s243_s18 = smul.f32 %s1562_s2, %s1562_s2  ;;  %v245_v49 = vstv %s1562_s2 }
 0x274   :  { %s242_s19 = smul.f32 0.0034722222, %s1296_s30  ;;  %v246_v51 = vsub.f32 %v1545_v3, %v245_v49  ;;  %v247_v54 = vsub.f32 %v1543_v2, %v245_v49  ;;  %v248_v56 = vsub.f32 %v1553_v8, %v245_v49 }
 0x276   :  { %s244_s26 = ssub.f32 %s242_s19, %s243_s18 }
 0x278   :  { %s249_s0 = sadd.f32 1e-05, %s244_s26 }
 0x27a   :  { %v250_v33 = vstv %s249_s0 }
 0x27b   :  { %1326 = vrsqrt.f32 %v250_v33  ;;  %vm257_vm12 = vweird.f32 %v250_v33 }
 0x281   :  { %v1327_v34 = vpop.eup %1326 }
 0x282   :  { %v252_v35 = vmul.f32 %v1327_v34, %v250_v33  ;;  %vm258_vm11 = vweird.f32 %v1327_v34 }
 0x283   :  { %vm259_vm13 = vmor %vm257_vm12, %vm258_vm11  ;;  %vm1113_vm11 = vcmask 1041408   ;;  %vm1115_vm12 = vcmask 1043456  }
 0x284   :  { %v253_v36 = vmul.f32 %v1327_v34, %v252_v35 }
 0x286   :  { %v254_v37 = vmul.f32 0.5, %v253_v36 }
 0x288   :  { %v255_v38 = vsub.f32 1.5, %v254_v37 }
 0x28a   :  { %v256_v39 = vmul.f32 %v1327_v34, %v255_v38 }
 0x28c   :  { %v260_v40 = vsel %vm259_vm13, %v1327_v34, %v256_v39 }
 0x28d   :  { %1297 = vpush %v260_v40 }
 0x2b1   :  { %v416_v43 = vpop.permute.xlu0 %415 }
 0x2b2   :  { %v431_v44 = vmul.f32 %v1705_v42, %v416_v43 }
 0x2b3   :  { %v503_v29 = vpop.f32.mrf.mxu0 }
 0x2b4   :  { %v529_v31 = vadd.f32 %v1692_v30, %v503_v29 }
 0x2b6   :  { %531 = vrot.lane.b32.xlu0 %v529_v31, %s1395_s14 }
 0x2be   :  { %s1298_s22 = spop %1297 }
 0x2bf   :  { %v262_v52 = vstv %s1298_s22 }
 0x2c0   :  { %v263_v53 = vmul.f32 %v262_v52, %v246_v51  ;;  %v264_v55 = vmul.f32 %v262_v52, %v247_v54  ;;  %v265_v57 = vmul.f32 %v262_v52, %v248_v56 }
 0x2c2   :  { %1242 = vmatmul.msk.f32.vlgmr.msra.gmra.mxu2 %vm208_vm9, %v263_v53 }
 0x2c3   :  { %782 = vmatpush.msra.mxu2 %v1624_v9 }
 0x2c5   :  { %783 = vmatpush.msra.mxu2 %v1629_v10 }
 0x2c7   :  { %784 = vmatpush.msra.mxu2 %v1645_v14 }
 0x2c9   :  { %785 = vmatpush.msra.mxu2 %v1653_v15 }
 0x2ca   :  { %1243 = vmatmul.msk.f32.gmra.mxu2 %vm208_vm9, %v264_v55 }
 0x2d2   :  { %1244 = vmatmul.msk.f32.gmra.mxu2 %vm208_vm9, %v265_v57 }
 0x328   :  { %v532_v61 = vpop.permute.xlu0 %531 }
 0x345   :  { %v298_v0 = vpop.f32.mrf.mxu2 }
 0x346   :  { %v299_v1 = vadd.f32 %v1307_v63, %v298_v0 }
 0x348   :  { %v307_v2 = vmax.f32 %v299_v1, 0.0 }
 0x34a   :  { %1245 = vmatmul.msk.f32.vlgmr.msrb.gmra.mxu1 %vm67_vm0, %v307_v2 }
 0x34b   :  { %992 = vmatpush.msrb.mxu1 %v1624_v9 }
 0x34d   :  { %v301_v3 = vpop.f32.mrf.mxu2  ;;  %993 = vmatpush.msrb.mxu1 %v1629_v10 }
 0x34e   :  { %v302_v4 = vadd.f32 %v1307_v63, %v301_v3 }
 0x34f   :  { %994 = vmatpush.msrb.mxu1 %v1645_v14 }
 0x350   :  { %v308_v5 = vmax.f32 %v302_v4, 0.0 }
 0x351   :  { %995 = vmatpush.msrb.mxu1 %v1653_v15 }
 0x352   :  { %1246 = vmatmul.msk.f32.vlgmr.msrb.gmra.mxu3 %vm67_vm0, %v308_v5 }
 0x353   :  { %710 = vmatpush.msrb.mxu3 %v1624_v9 }
 0x355   :  { %v304_v6 = vpop.f32.mrf.mxu2  ;;  %711 = vmatpush.msrb.mxu3 %v1629_v10 }
 0x356   :  { %v305_v7 = vadd.f32 %v1307_v63, %v304_v6 }
 0x357   :  { %712 = vmatpush.msrb.mxu3 %v1645_v14 }
 0x358   :  { %v309_v8 = vmax.f32 %v305_v7, 0.0 }
 0x359   :  { %713 = vmatpush.msrb.mxu3 %v1653_v15 }
 0x35a   :  { %1247 = vmatmul.msk.f32.gmra.mxu3 %vm67_vm0, %v309_v8 }
 0x3c7   :  { %v348_v16 = vpop.f32.mrf.mxu1 }
 0x3c8   :  { %v349_v17 = vadd.f32 %v1308_v13, %v348_v16 }
 0x3ca   :  { %v357_v18 = vmax.f32 %v349_v17, 0.0 }
 0x3cc   :  { %1248 = vmatmul.msk.f32.vlgmr.msrb.gmra.mxu2 %vm368_vm14, %v357_v18 }
 0x3cd   :  { %1064 = vmatpush.msrb.mxu2 %v1624_v9 }
 0x3cf   :  { %1065 = vmatpush.msrb.mxu2 %v1629_v10 }
 0x3d1   :  { %1066 = vmatpush.msrb.mxu2 %v1645_v14 }
 0x3d3   :  { %1067 = vmatpush.msrb.mxu2 %v1653_v15 }
 0x3d5   :  { %v351_v20 = vpop.f32.mrf.mxu3 }
 0x3d6   :  { %v352_v21 = vadd.f32 %v1308_v13, %v351_v20 }
 0x3d8   :  { %v358_v22 = vmax.f32 %v352_v21, 0.0 }
 0x3da   :  { %1249 = vmatmul.msk.f32.gmra.mxu2 %vm368_vm14, %v358_v22 }
 0x3dd   :  { %v354_v23 = vpop.f32.mrf.mxu3 }
 0x3de   :  { %v355_v24 = vadd.f32 %v1308_v13, %v354_v23 }
 0x3e0   :  { %v359_v25 = vmax.f32 %v355_v24, 0.0 }
 0x3e2   :  { %1250 = vmatmul.msk.f32.gmra.mxu2 %vm368_vm14, %v359_v25 }
 0x44f   :  { %v395_v33 = vpop.f32.mrf.mxu2 }
 0x450   :  { %v396_v34 = vadd.f32 %v1310_v32, %v395_v33 }
 0x452   :  { %v404_v35 = vmax.f32 %v396_v34, 0.0 }
 0x454   :  { %1251 = vmatmul.msk.f32.vlgmr.msra.gmra.mxu1 %vm208_vm9, %v404_v35 }
 0x45d   :  { %v398_v36 = vpop.f32.mrf.mxu2 }
 0x45e   :  { %v399_v37 = vadd.f32 %v1310_v32, %v398_v36 }
 0x460   :  { %v405_v38 = vmax.f32 %v399_v37, 0.0 }
 0x462   :  { %1252 = vmatmul.msk.f32.gmra.mxu1 %vm208_vm9, %v405_v38 }
 0x465   :  { %v401_v39 = vpop.f32.mrf.mxu2 }
 0x466   :  { %v402_v40 = vadd.f32 %v1310_v32, %v401_v39 }
 0x468   :  { %v406_v41 = vmax.f32 %v402_v40, 0.0 }
 0x46a   :  { %1253 = vmatmul.msk.f32.gmra.mxu1 %vm208_vm9, %v406_v41 }
 0x4d1   :  { %v460_v46 = vpop.f32.mrf.mxu1 }
 0x4d2   :  { %v461_v47 = vadd.f32 %v460_v46, %v431_v44 }
 0x4d4   :  { %v1714_v48 = vadd.f32 %v1711_v45, %v461_v47 }
 0x4d6   :  { %v506_v49 = vadd.f32 %v503_v29, %v1714_v48 }
 0x4d8   :  { %v1254_v50 = vmul.f32 -1.442695, %v506_v49 }
 0x4da   :  { %1328 = vpow2.f32 %v1254_v50 }
 0x4e0   :  { %v1329_v51 = vpop.eup %1328 }
 0x4e1   :  { %v510_v52 = vadd.f32 1.0, %v1329_v51 }
 0x4e3   :  { %1330 = vrcp.f32 %v510_v52  ;;  %v522_v56 = vand.u32 2147483648, %v510_v52  ;;  %v520_v58 = vand.u32 2147483647, %v510_v52  ;;  %vm516_vm0 = vweird.f32 %v510_v52 }
 0x4e5   :  { %v523_v60 = vor.u32 1.1754944e-38, %v522_v56  ;;  %vm521_vm2 = vcmp.eq.f32.partialorder %v520_v58, 8.507059e+37 }
 0x4e9   :  { %v1331_v53 = vpop.eup %1330 }
 0x4ea   :  { %v512_v54 = vmul.f32 %v1331_v53, %v510_v52  ;;  %vm517_vm15 = vweird.f32 %v1331_v53 }
 0x4eb   :  { %vm518_vm1 = vmor %vm516_vm0, %vm517_vm15 }
 0x4ec   :  { %v513_v55 = vsub.f32 1.0, %v512_v54 }
 0x4ee   :  { %v514_v57 = vmul.f32 %v1331_v53, %v513_v55 }
 0x4f0   :  { %v515_v59 = vadd.f32 %v1331_v53, %v514_v57 }
 0x4f2   :  { %v519_v62 = vsel %vm518_vm1, %v1331_v53, %v515_v59 }
 0x4f3   :  { %v524_v63 = vsel %vm521_vm2, %v523_v60, %v519_v62  ;;  %vm1117_vm2 = vcmask 1045504  }
 0x4f4   :  { %v534_v0 = vmul.f32 %v532_v61, %v524_v63  ;;  %v541_v4 = vsub.f32 1.0, %v524_v63  ;;  %v547_v6 = vmul.f32 0.0, %v524_v63 }
 0x4f6   :  { %536 = vrot.lane.b32.xlu2 %v534_v0, %s1395_s14 }
 0x550   :  { %v537_v1 = vpop.permute.xlu2 %536 }
 0x551   :  { %v539_v2 = vadd.f32 %v537_v1, %v1714_v48 }
 0x553   :  { %1332 = vtanh.f32 %v539_v2 }
 0x559   :  { %v1333_v3 = vpop.eup %1332 }
 0x55a   :  { %543 = vrot.lane.b32.xlu0 %v1333_v3, %s1398_s11 }
 0x5cc   :  { %v544_v5 = vpop.permute.xlu0 %543 }
 0x5cd   :  { %v546_v7 = vmul.f32 %v544_v5, %v541_v4 }
 0x5cf   :  { %v1720_v8 = vadd.f32 %v547_v6, %v546_v7 }
 0x5d1   :  { %550 = vrot.lane.b32.xlu2 %v1720_v8, %s1398_s11  ;;  %v616_v35 = vrot.slane %v1720_v8, 6 }
 0x62b   :  { %v551_v11 = vpop.permute.xlu2 %550 }
 0x62c   :  { %1255 = vmatmul.msk.f32.vlgmr.msra.gmra.mxu3 %vm368_vm14, %v551_v11 }
 0x62d   :  { %920 = vmatpush.msra.mxu3 %v1624_v9 }
 0x62f   :  { %921 = vmatpush.msra.mxu3 %v1629_v10 }
 0x631   :  { %922 = vmatpush.msra.mxu3 %v1645_v14 }
 0x633   :  { %923 = vmatpush.msra.mxu3 %v1653_v15 }
 0x6af   :  { %v571_v12 = vpop.f32.mrf.mxu3 }
 0x6b0   :  { %v597_v13 = vadd.f32 %v571_v12, %v1692_v30  ;;  %v575_v17 = vrot.slane %v571_v12, 6 }
 0x6b2   :  { %v599_v16 = vrot.slane %v597_v13, 6  ;;  %v577_v18 = vadd.f32 %v575_v17, %v1714_v48 }
 0x6b4   :  { %600 = vrot.lane.b32.xlu0 %v599_v16, %s1395_s14  ;;  %v1256_v19 = vmul.f32 -1.442695, %v577_v18 }
 0x6b6   :  { %1334 = vpow2.f32 %v1256_v19 }
 0x6bc   :  { %v1335_v20 = vpop.eup %1334 }
 0x6bd   :  { %v581_v21 = vadd.f32 1.0, %v1335_v20 }
 0x6bf   :  { %1336 = vrcp.f32 %v581_v21  ;;  %v593_v15 = vand.u32 2147483648, %v581_v21  ;;  %vm587_vm4 = vweird.f32 %v581_v21  ;;  %v591_v24 = vand.u32 2147483647, %v581_v21 }
 0x6c1   :  { %v594_v26 = vor.u32 1.1754944e-38, %v593_v15  ;;  %vm592_vm6 = vcmp.eq.f32.partialorder %v591_v24, 8.507059e+37 }
 0x6c5   :  { %v1337_v9 = vpop.eup %1336 }
 0x6c6   :  { %v583_v10 = vmul.f32 %v1337_v9, %v581_v21  ;;  %vm588_vm3 = vweird.f32 %v1337_v9 }
 0x6c7   :  { %vm589_vm5 = vmor %vm587_vm4, %vm588_vm3 }
 0x6c8   :  { %v584_v22 = vsub.f32 1.0, %v583_v10 }
 0x6ca   :  { %v585_v14 = vmul.f32 %v1337_v9, %v584_v22 }
 0x6cc   :  { %v586_v23 = vadd.f32 %v1337_v9, %v585_v14 }
 0x6ce   :  { %v590_v25 = vsel %vm589_vm5, %v1337_v9, %v586_v23 }
 0x6cf   :  { %v595_v28 = vsel %vm592_vm6, %v594_v26, %v590_v25 }
 0x6d0   :  { %v610_v34 = vsub.f32 1.0, %v595_v28  ;;  %v618_v38 = vmul.f32 %v616_v35, %v595_v28 }
 0x726   :  { %v601_v27 = vpop.permute.xlu0 %600 }
 0x727   :  { %v603_v29 = vmul.f32 %v601_v27, %v595_v28 }
 0x729   :  { %605 = vrot.lane.b32.xlu2 %v603_v29, %s1395_s14 }
 0x783   :  { %v606_v31 = vpop.permute.xlu2 %605 }
 0x784   :  { %v608_v32 = vadd.f32 %v606_v31, %v1714_v48 }
 0x786   :  { %1338 = vtanh.f32 %v608_v32 }
 0x78c   :  { %v1339_v33 = vpop.eup %1338 }
 0x78d   :  { %612 = vrot.lane.b32.xlu1 %v1339_v33, %s1398_s11 }
 0x7ff   :  { %v613_v36 = vpop.permute.xlu1 %612 }
 0x800   :  { %v615_v37 = vmul.f32 %v613_v36, %v610_v34 }
 0x802   :  { %v619_v39 = vadd.f32 %v618_v38, %v615_v37  ;;  %v410_v37 = vld [vmem:[%s1869_s1 + $0x8] sm:$0xff] }
 0x804   :  { %v621_v40 = vrot.slane %v619_v39, 2  ;;  %v688_v62 = vrot.slane %v619_v39, 6  ;;  %v1114_v13 = vsel %vm1113_vm11, %v1720_v8, %v619_v39 }
 0x806   :  { %622 = vrot.lane.b32.xlu0 %v621_v40, %s1398_s11 }
 0x878   :  { %v623_v41 = vpop.permute.xlu0 %622 }
 0x879   :  { %1257 = vmatmul.msk.f32.vlgmr.msra.gmra.mxu0 %vm368_vm14, %v623_v41 }
 0x8f6   :  { %v643_v43 = vpop.f32.mrf.mxu0 }
 0x8f7   :  { %v647_v44 = vrot.slane %v643_v43, 4  ;;  %v669_v46 = vadd.f32 %v643_v43, %v1692_v30 }
 0x8f9   :  { %v649_v47 = vadd.f32 %v647_v44, %v1714_v48  ;;  %v671_v49 = vrot.slane %v669_v46, 4 }
 0x8fb   :  { %v1258_v50 = vmul.f32 -1.442695, %v649_v47  ;;  %672 = vrot.lane.b32.xlu2 %v671_v49, %s1395_s14 }
 0x8fd   :  { %1340 = vpow2.f32 %v1258_v50 }
 0x903   :  { %v1341_v51 = vpop.eup %1340 }
 0x904   :  { %v653_v52 = vadd.f32 1.0, %v1341_v51 }
 0x906   :  { %1342 = vrcp.f32 %v653_v52  ;;  %v665_v56 = vand.u32 2147483648, %v653_v52  ;;  %v663_v58 = vand.u32 2147483647, %v653_v52  ;;  %vm659_vm8 = vweird.f32 %v653_v52 }
 0x908   :  { %v666_v60 = vor.u32 1.1754944e-38, %v665_v56  ;;  %vm664_vm10 = vcmp.eq.f32.partialorder %v663_v58, 8.507059e+37 }
 0x90c   :  { %v1343_v53 = vpop.eup %1342 }
 0x90d   :  { %v655_v54 = vmul.f32 %v1343_v53, %v653_v52  ;;  %vm660_vm7 = vweird.f32 %v1343_v53 }
 0x90e   :  { %vm661_vm9 = vmor %vm659_vm8, %vm660_vm7 }
 0x90f   :  { %v656_v55 = vsub.f32 1.0, %v655_v54  ;;  %v463_v54 = vpop.f32.mrf.mxu1 }
 0x911   :  { %v657_v57 = vmul.f32 %v1343_v53, %v656_v55 }
 0x913   :  { %v658_v59 = vadd.f32 %v1343_v53, %v657_v57 }
 0x915   :  { %v662_v61 = vsel %vm661_vm9, %v1343_v53, %v658_v59 }
 0x916   :  { %v667_v63 = vsel %vm664_vm10, %v666_v60, %v662_v61 }
 0x917   :  { %v690_v0 = vmul.f32 %v688_v62, %v667_v63  ;;  %v682_v6 = vsub.f32 1.0, %v667_v63 }
 0x955   :  { %v673_v1 = vpop.permute.xlu2 %672 }
 0x956   :  { %v675_v2 = vmul.f32 %v673_v1, %v667_v63 }
 0x958   :  { %677 = vrot.lane.b32.xlu0 %v675_v2, %s1395_s14 }
 0x9ca   :  { %v678_v3 = vpop.permute.xlu0 %677 }
 0x9cb   :  { %v680_v4 = vadd.f32 %v678_v3, %v1714_v48 }
 0x9cd   :  { %1344 = vtanh.f32 %v680_v4 }
 0x9d3   :  { %v1345_v5 = vpop.eup %1344 }
 0x9d4   :  { %684 = vrot.lane.b32.xlu2 %v1345_v5, %s1398_s11 }
 0xa2e   :  { %v685_v7 = vpop.permute.xlu2 %684 }
 0xa2f   :  { %v687_v11 = vmul.f32 %v685_v7, %v682_v6 }
 0xa31   :  { %v691_v12 = vadd.f32 %v690_v0, %v687_v11 }
 0xa33   :  { %v693_v16 = vrot.slane %v691_v12, 4  ;;  %v1116_v17 = vsel %vm1115_vm12, %v1114_v13, %v691_v12  ;;  %v760_v32 = vrot.slane %v691_v12, 6 }
 0xa35   :  { %694 = vrot.lane.b32.xlu0 %v693_v16, %s1398_s11 }
 0xaa7   :  { %v695_v18 = vpop.permute.xlu0 %694 }
 0xaa8   :  { %1259 = vmatmul.msk.f32.vlgmr.msrb.gmra.mxu3 %vm368_vm14, %v695_v18 }
 0xb2b   :  { %v715_v19 = vpop.f32.mrf.mxu3 }
 0xb2c   :  { %v719_v20 = vrot.slane %v715_v19, 2  ;;  %v741_v21 = vadd.f32 %v715_v19, %v1692_v30 }
 0xb2e   :  { %v721_v9 = vadd.f32 %v719_v20, %v1714_v48  ;;  %v743_v10 = vrot.slane %v741_v21, 2 }
 0xb30   :  { %v1260_v22 = vmul.f32 -1.442695, %v721_v9  ;;  %744 = vrot.lane.b32.xlu2 %v743_v10, %s1395_s14 }
 0xb32   :  { %1346 = vpow2.f32 %v1260_v22 }
 0xb38   :  { %v1347_v8 = vpop.eup %1346 }
 0xb39   :  { %v725_v14 = vadd.f32 1.0, %v1347_v8 }
 0xb3b   :  { %1348 = vrcp.f32 %v725_v14  ;;  %v737_v25 = vand.u32 2147483648, %v725_v14  ;;  %v735_v27 = vand.u32 2147483647, %v725_v14  ;;  %vm731_vm15 = vweird.f32 %v725_v14 }
 0xb3d   :  { %v738_v29 = vor.u32 1.1754944e-38, %v737_v25  ;;  %vm736_vm1 = vcmp.eq.f32.partialorder %v735_v27, 8.507059e+37 }
 0xb41   :  { %v1349_v23 = vpop.eup %1348 }
 0xb42   :  { %v727_v15 = vmul.f32 %v1349_v23, %v725_v14  ;;  %vm732_vm13 = vweird.f32 %v1349_v23 }
 0xb43   :  { %vm733_vm0 = vmor %vm731_vm15, %vm732_vm13 }
 0xb44   :  { %v728_v24 = vsub.f32 1.0, %v727_v15 }
 0xb46   :  { %v729_v26 = vmul.f32 %v1349_v23, %v728_v24 }
 0xb48   :  { %v730_v28 = vadd.f32 %v1349_v23, %v729_v26 }
 0xb4a   :  { %v734_v31 = vsel %vm733_vm0, %v1349_v23, %v730_v28 }
 0xb4b   :  { %v739_v33 = vsel %vm736_vm1, %v738_v29, %v734_v31 }
 0xb4c   :  { %v762_v34 = vmul.f32 %v760_v32, %v739_v33  ;;  %v754_v41 = vsub.f32 1.0, %v739_v33 }
 0xb8a   :  { %v745_v35 = vpop.permute.xlu2 %744 }
 0xb8b   :  { %v747_v36 = vmul.f32 %v745_v35, %v739_v33 }
 0xb8d   :  { %749 = vrot.lane.b32.xlu1 %v747_v36, %s1395_s14 }
 0xb95   :  { %420 = vperm.xlu1 %1305, %v410_v37  }
 0xbff   :  { %v750_v38 = vpop.permute.xlu1 %749 }
 0xc00   :  { %v752_v39 = vadd.f32 %v750_v38, %v1714_v48 }
 0xc02   :  { %1350 = vtanh.f32 %v752_v39 }
 0xc07   :  { %v421_v52 = vpop.permute.xlu1 %420 }
 0xc08   :  { %v1351_v40 = vpop.eup %1350  ;;  %v432_v53 = vmul.f32 %v1705_v42, %v421_v52 }
 0xc09   :  { %756 = vrot.lane.b32.xlu0 %v1351_v40, %s1398_s11 }
 0xc0a   :  { %v464_v55 = vadd.f32 %v463_v54, %v432_v53 }
 0xc0c   :  { %v1767_v56 = vadd.f32 %v1711_v45, %v464_v55 }
 0xc7b   :  { %v757_v43 = vpop.permute.xlu0 %756 }
 0xc7c   :  { %v759_v44 = vmul.f32 %v757_v43, %v754_v41 }
 0xc7e   :  { %v763_v46 = vadd.f32 %v762_v34, %v759_v44 }
 0xc80   :  { %v765_v47 = vrot.slane %v763_v46, 6  ;;  %v1759_v49 = vsel %vm1117_vm2, %v1116_v17, %v763_v46 }
 0xc82   :  { %766 = vrot.lane.b32.xlu2 %v765_v47, %s1398_s11 }
 0xcdc   :  { %v767_v50 = vpop.permute.xlu2 %766 }
 0xcdd   :  { %1261 = vmatmul.msk.f32.vlgmr.msra.gmra.mxu2 %vm368_vm14, %v767_v50 }
 0xd60   :  { %v787_v51 = vpop.f32.mrf.mxu2 }
 0xd61   :  { %v810_v48 = vadd.f32 %v787_v51, %v1692_v30  ;;  %v790_v57 = vadd.f32 %v787_v51, %v1767_v56 }
 0xd63   :  { %812 = vrot.lane.b32.xlu0 %v810_v48, %s1395_s14  ;;  %v1262_v58 = vmul.f32 -1.442695, %v790_v57 }
 0xd65   :  { %1352 = vpow2.f32 %v1262_v58 }
 0xd6b   :  { %v1353_v59 = vpop.eup %1352 }
 0xd6c   :  { %v794_v60 = vadd.f32 1.0, %v1353_v59 }
 0xd6e   :  { %1354 = vrcp.f32 %v794_v60  ;;  %v806_v2 = vand.u32 2147483648, %v794_v60  ;;  %vm800_vm4 = vweird.f32 %v794_v60  ;;  %v804_v3 = vand.u32 2147483647, %v794_v60 }
 0xd70   :  { %v807_v5 = vor.u32 1.1754944e-38, %v806_v2  ;;  %vm805_vm6 = vcmp.eq.f32.partialorder %v804_v3, 8.507059e+37 }
 0xd74   :  { %v1355_v61 = vpop.eup %1354 }
 0xd75   :  { %v796_v62 = vmul.f32 %v1355_v61, %v794_v60  ;;  %vm801_vm3 = vweird.f32 %v1355_v61 }
 0xd76   :  { %vm802_vm5 = vmor %vm800_vm4, %vm801_vm3 }
 0xd77   :  { %v797_v63 = vsub.f32 1.0, %v796_v62 }
 0xd79   :  { %v798_v0 = vmul.f32 %v1355_v61, %v797_v63 }
 0xd7b   :  { %v799_v1 = vadd.f32 %v1355_v61, %v798_v0 }
 0xd7d   :  { %v803_v4 = vsel %vm802_vm5, %v1355_v61, %v799_v1 }
 0xd7e   :  { %v808_v7 = vsel %vm805_vm6, %v807_v5, %v803_v4 }
 0xd7f   :  { %v822_v17 = vsub.f32 1.0, %v808_v7  ;;  %v829_v19 = vmul.f32 %v808_v7, %v765_v47 }
 0xdd5   :  { %v813_v6 = vpop.permute.xlu0 %812 }
 0xdd6   :  { %v815_v11 = vmul.f32 %v813_v6, %v808_v7 }
 0xdd8   :  { %817 = vrot.lane.b32.xlu2 %v815_v11, %s1395_s14 }
 0xe32   :  { %v818_v12 = vpop.permute.xlu2 %817 }
 0xe33   :  { %v820_v13 = vadd.f32 %v818_v12, %v1767_v56 }
 0xe35   :  { %1356 = vtanh.f32 %v820_v13 }
 0xe3b   :  { %v1357_v16 = vpop.eup %1356 }
 0xe3c   :  { %824 = vrot.lane.b32.xlu1 %v1357_v16, %s1398_s11 }
 0xeae   :  { %v825_v18 = vpop.permute.xlu1 %824 }
 0xeaf   :  { %v827_v20 = vmul.f32 %v825_v18, %v822_v17 }
 0xeb1   :  { %v1773_v21 = vadd.f32 %v829_v19, %v827_v20 }
 0xeb3   :  { %832 = vrot.lane.b32.xlu0 %v1773_v21, %s1398_s11  ;;  %v898_v44 = vrot.slane %v1773_v21, 6 }
 0xf25   :  { %v833_v9 = vpop.permute.xlu0 %832 }
 0xf26   :  { %1263 = vmatmul.msk.f32.vlgmr.msrb.gmra.mxu0 %vm368_vm14, %v833_v9 }
 0xfa3   :  { %v853_v10 = vpop.f32.mrf.mxu0 }
 0xfa4   :  { %v879_v22 = vadd.f32 %v853_v10, %v1692_v30  ;;  %v857_v14 = vrot.slane %v853_v10, 6 }
 0xfa6   :  { %v881_v8 = vrot.slane %v879_v22, 6  ;;  %v859_v23 = vadd.f32 %v857_v14, %v1767_v56 }
 0xfa8   :  { %882 = vrot.lane.b32.xlu2 %v881_v8, %s1395_s14  ;;  %v1264_v15 = vmul.f32 -1.442695, %v859_v23 }
 0xfaa   :  { %1358 = vpow2.f32 %v1264_v15 }
 0xfb0   :  { %v1359_v24 = vpop.eup %1358 }
 0xfb1   :  { %v863_v25 = vadd.f32 1.0, %v1359_v24  ;;  %v466_v24 = vpop.f32.mrf.mxu1 }
 0xfb3   :  { %1360 = vrcp.f32 %v863_v25  ;;  %v875_v32 = vand.u32 2147483648, %v863_v25  ;;  %vm869_vm8 = vweird.f32 %v863_v25  ;;  %v873_v33 = vand.u32 2147483647, %v863_v25 }
 0xfb5   :  { %v876_v35 = vor.u32 1.1754944e-38, %v875_v32  ;;  %vm874_vm10 = vcmp.eq.f32.partialorder %v873_v33, 8.507059e+37 }
 0xfb9   :  { %v1361_v26 = vpop.eup %1360 }
 0xfba   :  { %v865_v27 = vmul.f32 %v1361_v26, %v863_v25  ;;  %vm870_vm7 = vweird.f32 %v1361_v26 }
 0xfbb   :  { %vm871_vm9 = vmor %vm869_vm8, %vm870_vm7 }
 0xfbc   :  { %v866_v28 = vsub.f32 1.0, %v865_v27 }
 0xfbe   :  { %v867_v29 = vmul.f32 %v1361_v26, %v866_v28 }
 0xfc0   :  { %v868_v31 = vadd.f32 %v1361_v26, %v867_v29 }
 0xfc2   :  { %v872_v34 = vsel %vm871_vm9, %v1361_v26, %v868_v31 }
 0xfc3   :  { %v877_v37 = vsel %vm874_vm10, %v876_v35, %v872_v34 }
 0xfc4   :  { %v892_v43 = vsub.f32 1.0, %v877_v37  ;;  %v900_v50 = vmul.f32 %v898_v44, %v877_v37 }
0x1002   :  { %v883_v36 = vpop.permute.xlu2 %882 }
0x1003   :  { %v885_v38 = vmul.f32 %v883_v36, %v877_v37 }
0x1005   :  { %887 = vrot.lane.b32.xlu1 %v885_v38, %s1395_s14 }
0x1077   :  { %v888_v39 = vpop.permute.xlu1 %887 }
0x1078   :  { %v890_v40 = vadd.f32 %v888_v39, %v1767_v56 }
0x107a   :  { %1362 = vtanh.f32 %v890_v40 }
0x1080   :  { %v1363_v41 = vpop.eup %1362 }
0x1081   :  { %894 = vrot.lane.b32.xlu0 %v1363_v41, %s1398_s11 }
0x10f3   :  { %v895_v46 = vpop.permute.xlu0 %894 }
0x10f4   :  { %v897_v47 = vmul.f32 %v895_v46, %v892_v43 }
0x10f6   :  { %v901_v51 = vadd.f32 %v900_v50, %v897_v47  ;;  %v411_v47 = vld [vmem:[%s1869_s1 + $0x10] sm:$0x3] }
0x10f8   :  { %v903_v48 = vrot.slane %v901_v51, 2  ;;  %v970_v19 = vrot.slane %v901_v51, 6  ;;  %v1119_v8 = vsel %vm1113_vm11, %v1773_v21, %v901_v51 }
0x10fa   :  { %904 = vrot.lane.b32.xlu2 %v903_v48, %s1398_s11 }
0x1154   :  { %v905_v52 = vpop.permute.xlu2 %904 }
0x1155   :  { %1265 = vmatmul.msk.f32.vlgmr.msra.gmra.mxu3 %vm368_vm14, %v905_v52 }
0x11d8   :  { %v925_v53 = vpop.f32.mrf.mxu3 }
0x11d9   :  { %v951_v54 = vadd.f32 %v925_v53, %v1692_v30  ;;  %v929_v57 = vrot.slane %v925_v53, 4 }
0x11db   :  { %v953_v55 = vrot.slane %v951_v54, 4  ;;  %v931_v58 = vadd.f32 %v929_v57, %v1767_v56 }
0x11dd   :  { %954 = vrot.lane.b32.xlu1 %v953_v55, %s1395_s14  ;;  %v1266_v59 = vmul.f32 -1.442695, %v931_v58 }
0x11df   :  { %1364 = vpow2.f32 %v1266_v59 }
0x11e5   :  { %v1365_v60 = vpop.eup %1364 }
0x11e6   :  { %v935_v61 = vadd.f32 1.0, %v1365_v60 }
0x11e8   :  { %1366 = vrcp.f32 %v935_v61  ;;  %v947_v3 = vand.u32 2147483648, %v935_v61  ;;  %vm941_vm15 = vweird.f32 %v935_v61  ;;  %v945_v4 = vand.u32 2147483647, %v935_v61 }
0x11ea   :  { %v948_v6 = vor.u32 1.1754944e-38, %v947_v3  ;;  %vm946_vm1 = vcmp.eq.f32.partialorder %v945_v4, 8.507059e+37 }
0x11ee   :  { %v1367_v62 = vpop.eup %1366 }
0x11ef   :  { %v937_v63 = vmul.f32 %v1367_v62, %v935_v61  ;;  %vm942_vm13 = vweird.f32 %v1367_v62 }
0x11f0   :  { %vm943_vm0 = vmor %vm941_vm15, %vm942_vm13 }
0x11f1   :  { %v938_v0 = vsub.f32 1.0, %v937_v63 }
0x11f3   :  { %v939_v1 = vmul.f32 %v1367_v62, %v938_v0 }
0x11f5   :  { %v940_v2 = vadd.f32 %v1367_v62, %v939_v1 }
0x11f7   :  { %v944_v5 = vsel %vm943_vm0, %v1367_v62, %v940_v2 }
0x11f8   :  { %v949_v11 = vsel %vm946_vm1, %v948_v6, %v944_v5 }
0x11f9   :  { %v964_v18 = vsub.f32 1.0, %v949_v11  ;;  %v972_v9 = vmul.f32 %v970_v19, %v949_v11 }
0x124f   :  { %v955_v7 = vpop.permute.xlu1 %954 }
0x1250   :  { %v957_v12 = vmul.f32 %v955_v7, %v949_v11 }
0x1252   :  { %959 = vrot.lane.b32.xlu0 %v957_v12, %s1395_s14 }
0x12c4   :  { %v960_v13 = vpop.permute.xlu0 %959 }
0x12c5   :  { %v962_v16 = vadd.f32 %v960_v13, %v1767_v56 }
0x12c7   :  { %1368 = vtanh.f32 %v962_v16 }
0x12cd   :  { %v1369_v17 = vpop.eup %1368 }
0x12ce   :  { %966 = vrot.lane.b32.xlu2 %v1369_v17, %s1398_s11 }
0x1328   :  { %v967_v20 = vpop.permute.xlu2 %966 }
0x1329   :  { %v969_v10 = vmul.f32 %v967_v20, %v964_v18 }
0x132b   :  { %v973_v22 = vadd.f32 %v972_v9, %v969_v10 }
0x132d   :  { %v975_v14 = vrot.slane %v973_v22, 4  ;;  %v1120_v23 = vsel %vm1115_vm12, %v1119_v8, %v973_v22  ;;  %v1042_v53 = vrot.slane %v973_v22, 6 }
0x132f   :  { %976 = vrot.lane.b32.xlu1 %v975_v14, %s1398_s11 }
0x13a1   :  { %v977_v15 = vpop.permute.xlu1 %976 }
0x13a2   :  { %1267 = vmatmul.msk.f32.vlgmr.msrb.gmra.mxu1 %vm368_vm14, %v977_v15 }
0x141f   :  { %v997_v25 = vpop.f32.mrf.mxu1 }
0x1420   :  { %v1023_v26 = vadd.f32 %v997_v25, %v1692_v30  ;;  %v1001_v28 = vrot.slane %v997_v25, 2  ;;  %v1313_v25 = vld [vmem:[%s1871_s16] ss:$0 sm:$0xff] }
0x1422   :  { %v1025_v27 = vrot.slane %v1023_v26, 2  ;;  %v1003_v29 = vadd.f32 %v1001_v28, %v1767_v56 }
0x1424   :  { %1026 = vrot.lane.b32.xlu0 %v1025_v27, %s1395_s14  ;;  %v1268_v31 = vmul.f32 -1.442695, %v1003_v29 }
0x1426   :  { %1370 = vpow2.f32 %v1268_v31 }
0x142c   :  { %v1371_v21 = vpop.eup %1370 }
0x142d   :  { %v1007_v32 = vadd.f32 1.0, %v1371_v21 }
0x142f   :  { %1372 = vrcp.f32 %v1007_v32  ;;  %v1019_v38 = vand.u32 2147483648, %v1007_v32  ;;  %vm1013_vm12 = vweird.f32 %v1007_v32  ;;  %v1017_v39 = vand.u32 2147483647, %v1007_v32 }
0x1431   :  { %v1020_v41 = vor.u32 1.1754944e-38, %v1019_v38  ;;  %vm1018_vm4 = vcmp.eq.f32.partialorder %v1017_v39, 8.507059e+37 }
0x1435   :  { %v1373_v33 = vpop.eup %1372 }
0x1436   :  { %v1009_v34 = vmul.f32 %v1373_v33, %v1007_v32  ;;  %vm1014_vm11 = vweird.f32 %v1373_v33 }
0x1437   :  { %vm1015_vm3 = vmor %vm1013_vm12, %vm1014_vm11 }
0x1438   :  { %v1010_v35 = vsub.f32 1.0, %v1009_v34 }
0x143a   :  { %v1011_v36 = vmul.f32 %v1373_v33, %v1010_v35 }
0x143c   :  { %v1012_v37 = vadd.f32 %v1373_v33, %v1011_v36 }
0x143e   :  { %v1016_v40 = vsel %vm1015_vm3, %v1373_v33, %v1012_v37 }
0x143f   :  { %v1021_v44 = vsel %vm1018_vm4, %v1020_v41, %v1016_v40 }
0x1440   :  { %v1036_v52 = vsub.f32 1.0, %v1021_v44  ;;  %v1044_v55 = vmul.f32 %v1042_v53, %v1021_v44 }
0x1496   :  { %v1027_v43 = vpop.permute.xlu0 %1026 }
0x1497   :  { %v1029_v46 = vmul.f32 %v1027_v43, %v1021_v44 }
0x1499   :  { %1031 = vrot.lane.b32.xlu2 %v1029_v46, %s1395_s14 }
0x14a1   :  { %425 = vperm.xlu2 %1306, %v411_v47  }
0x14f3   :  { %v1032_v50 = vpop.permute.xlu2 %1031 }
0x14f4   :  { %v1034_v51 = vadd.f32 %v1032_v50, %v1767_v56 }
0x14f6   :  { %1374 = vtanh.f32 %v1034_v51 }
0x14fb   :  { %v426_v63 = vpop.permute.xlu2 %425 }
0x14fc   :  { %v1375_v48 = vpop.eup %1374  ;;  %v433_v0 = vmul.f32 %v1705_v42, %v426_v63  ;;  %v1123_v42 = vld [vmem:[%s1870_s15 + $0x8] sm:$0xff] }
0x14fd   :  { %1038 = vrot.lane.b32.xlu1 %v1375_v48, %s1398_s11 }
0x14fe   :  { %v467_v1 = vadd.f32 %v466_v24, %v433_v0 }
0x1500   :  { %v475_v2 = vadd.f32 %v1711_v45, %v467_v1  ;;  %v1122_v45 = vld [vmem:[%s1870_s15] sm:$0xff] }
0x156f   :  { %v1039_v54 = vpop.permute.xlu1 %1038 }
0x1570   :  { %v1041_v57 = vmul.f32 %v1039_v54, %v1036_v52 }
0x1572   :  { %v1807_v58 = vadd.f32 %v1044_v55, %v1041_v57 }
0x1574   :  { %v1047_v59 = vrot.slane %v1807_v58, 6  ;;  %v1121_v60 = vsel %vm1117_vm2, %v1120_v23, %v1807_v58 }
0x1576   :  { %1048 = vrot.lane.b32.xlu0 %v1047_v59, %s1398_s11 }
0x15e8   :  { %v1049_v56 = vpop.permute.xlu0 %1048 }
0x15e9   :  { %1269 = vmatmul.msk.f32.vlgmr.msrb.gmra.mxu2 %vm368_vm14, %v1049_v56 }
0x166c   :  { %v1069_v61 = vpop.f32.mrf.mxu2 }
0x166d   :  { %v1092_v62 = vadd.f32 %v1069_v61, %v1692_v30  ;;  %v1072_v3 = vadd.f32 %v1069_v61, %v475_v2  ;;  %v1125_v30 = vld [vmem:[%s1870_s15 + $0x18] sm:$0xff] }
0x166e   :  { %1157 = vmatpush.msra.mxu0 %v1125_v30 }
0x166f   :  { %1094 = vrot.lane.b32.xlu1 %v1092_v62, %s1395_s14  ;;  %v1270_v4 = vmul.f32 -1.442695, %v1072_v3 }
0x1671   :  { %1376 = vpow2.f32 %v1270_v4 }
0x1677   :  { %1133 = vrot.lane.b32.xlu1 %v1759_v49, %s1398_s11  ;;  %v1377_v5 = vpop.eup %1376  ;;  %v1124_v49 = vld [vmem:[%s1870_s15 + $0x10] sm:$0xff] }
0x1678   :  { %v1076_v6 = vadd.f32 1.0, %v1377_v5  ;;  %1158 = vmatpush.msra.mxu0 %v1124_v49 }
0x167a   :  { %1378 = vrcp.f32 %v1076_v6  ;;  %1159 = vmatpush.msra.mxu0 %v1123_v42  ;;  %v1088_v17 = vand.u32 2147483648, %v1076_v6  ;;  %vm1082_vm5 = vweird.f32 %v1076_v6  ;;  %v1086_v18 = vand.u32 2147483647, %v1076_v6 }
0x167c   :  { %1160 = vmatpush.msra.mxu0 %v1122_v45  ;;  %v1089_v20 = vor.u32 1.1754944e-38, %v1088_v17  ;;  %vm1087_vm7 = vcmp.eq.f32.partialorder %v1086_v18, 8.507059e+37 }
0x1680   :  { %v1379_v7 = vpop.eup %1378 }
0x1681   :  { %v1078_v11 = vmul.f32 %v1379_v7, %v1076_v6  ;;  %vm1083_vm2 = vweird.f32 %v1379_v7 }
0x1682   :  { %vm1084_vm6 = vmor %vm1082_vm5, %vm1083_vm2 }
0x1683   :  { %v1079_v12 = vsub.f32 1.0, %v1078_v11 }
0x1685   :  { %v1080_v13 = vmul.f32 %v1379_v7, %v1079_v12 }
0x1687   :  { %v1081_v16 = vadd.f32 %v1379_v7, %v1080_v13 }
0x1689   :  { %v1085_v19 = vsel %vm1084_vm6, %v1379_v7, %v1081_v16 }
0x168a   :  { %v1090_v10 = vsel %vm1087_vm7, %v1089_v20, %v1085_v19 }
0x168b   :  { %v1104_v41 = vsub.f32 1.0, %v1090_v10  ;;  %v1111_v44 = vmul.f32 %v1090_v10, %v1047_v59 }
0x16e1   :  { %v1095_v9 = vpop.permute.xlu1 %1094 }
0x16e2   :  { %v1097_v22 = vmul.f32 %v1095_v9, %v1090_v10 }
0x16e4   :  { %1099 = vrot.lane.b32.xlu0 %v1097_v22, %s1395_s14 }
0x16e9   :  { %v1134_v8 = vpop.permute.xlu1 %1133 }
0x16ea   :  { %1271 = vmatmul.msk.f32.vlgmr.msra.gmra.mxu0 %vm368_vm14, %v1134_v8 }
0x16ec   :  { %1135 = vrot.lane.b32.xlu0 %v1121_v60, %s1398_s11 }
0x1756   :  { %v1100_v14 = vpop.permute.xlu0 %1099 }
0x1757   :  { %v1102_v23 = vadd.f32 %v1100_v14, %v475_v2 }
0x1759   :  { %1380 = vtanh.f32 %v1102_v23 }
0x175e   :  { %v1136_v15 = vpop.permute.xlu0 %1135 }
0x175f   :  { %v1381_v24 = vpop.eup %1380  ;;  %1272 = vmatmul.msk.f32.gmra.mxu0 %vm368_vm14, %v1136_v15 }
0x1760   :  { %1106 = vrot.lane.b32.xlu2 %v1381_v24, %s1398_s11 }
0x1767   :  { %v1162_v26 = vpop.f32.mrf.mxu0 }
0x1768   :  { %v1163_v27 = vadd.f32 %v1313_v25, %v1162_v26 }
0x176a   :  { %v1274_v28 = vmul.f32 -1.442695, %v1163_v27 }
0x176c   :  { %1382 = vpow2.f32 %v1274_v28 }
0x1772   :  { %v1383_v29 = vpop.eup %1382 }
0x1773   :  { %v1180_v31 = vadd.f32 1.0, %v1383_v29 }
0x1775   :  { %1384 = vrcp.f32 %v1180_v31  ;;  %v1194_v34 = vand.u32 2147483648, %v1180_v31  ;;  %v1192_v36 = vand.u32 2147483647, %v1180_v31  ;;  %vm1188_vm9 = vweird.f32 %v1180_v31 }
0x1777   :  { %v1195_v38 = vor.u32 1.1754944e-38, %v1194_v34  ;;  %vm1193_vm13 = vcmp.eq.f32.partialorder %v1192_v36, 8.507059e+37 }
0x177b   :  { %v1385_v21 = vpop.eup %1384 }
0x177c   :  { %v1184_v32 = vmul.f32 %v1385_v21, %v1180_v31  ;;  %vm1189_vm8 = vweird.f32 %v1385_v21 }
0x177d   :  { %vm1190_vm10 = vmor %vm1188_vm9, %vm1189_vm8 }
0x177e   :  { %v1185_v33 = vsub.f32 1.0, %v1184_v32 }
0x1780   :  { %v1186_v35 = vmul.f32 %v1385_v21, %v1185_v33 }
0x1782   :  { %v1187_v37 = vadd.f32 %v1385_v21, %v1186_v35 }
0x1784   :  { %v1191_v39 = vsel %vm1190_vm10, %v1385_v21, %v1187_v37 }
0x1785   :  { %v1196_v40 = vsel %vm1193_vm13, %v1195_v38, %v1191_v39 }
0x1786   :  { %1228 = vst [vmem:[%s1872_s17] sm:$0xff] %v1196_v40 }
0x17ba   :  { %v1107_v43 = vpop.permute.xlu2 %1106 }
0x17bb   :  { %v1109_v46 = vmul.f32 %v1107_v43, %v1104_v41 }
0x17bd   :  { %v1112_v47 = vadd.f32 %v1111_v44, %v1109_v46 }
0x17bf   :  { %1137 = vrot.lane.b32.xlu2 %v1112_v47, %s1398_s11 }
0x17dc   :  { %v1165_v50 = vpop.f32.mrf.mxu0 }
0x17dd   :  { %v1166_v51 = vadd.f32 %v1313_v25, %v1165_v50 }
0x17df   :  { %v1275_v48 = vmul.f32 -1.442695, %v1166_v51 }
0x17e1   :  { %1386 = vpow2.f32 %v1275_v48 }
0x17e7   :  { %v1387_v52 = vpop.eup %1386 }
0x17e8   :  { %v1181_v53 = vadd.f32 1.0, %v1387_v52 }
0x17ea   :  { %1388 = vrcp.f32 %v1181_v53  ;;  %v1209_v60 = vand.u32 2147483648, %v1181_v53  ;;  %v1207_v61 = vand.u32 2147483647, %v1181_v53  ;;  %vm1203_vm0 = vweird.f32 %v1181_v53 }
0x17ec   :  { %v1210_v59 = vor.u32 1.1754944e-38, %v1209_v60  ;;  %vm1208_vm11 = vcmp.eq.f32.partialorder %v1207_v61, 8.507059e+37 }
0x17f0   :  { %v1389_v54 = vpop.eup %1388 }
0x17f1   :  { %v1199_v55 = vmul.f32 %v1389_v54, %v1181_v53  ;;  %vm1204_vm15 = vweird.f32 %v1389_v54 }
0x17f2   :  { %vm1205_vm1 = vmor %vm1203_vm0, %vm1204_vm15 }
0x17f3   :  { %v1200_v57 = vsub.f32 1.0, %v1199_v55 }
0x17f5   :  { %v1201_v56 = vmul.f32 %v1389_v54, %v1200_v57 }
0x17f7   :  { %v1202_v58 = vadd.f32 %v1389_v54, %v1201_v56 }
0x17f9   :  { %v1206_v62 = vsel %vm1205_vm1, %v1389_v54, %v1202_v58 }
0x17fa   :  { %v1211_v63 = vsel %vm1208_vm11, %v1210_v59, %v1206_v62 }
0x17fb   :  { %1229 = vst [vmem:[%s1872_s17 + $0x8] sm:$0xff] %v1211_v63 }
0x1819   :  { %v1138_v0 = vpop.permute.xlu2 %1137 }
0x181a   :  { %1273 = vmatmul.msk.f32.gmra.mxu0 %vm368_vm14, %v1138_v0 }
0x1897   :  { %v1168_v1 = vpop.f32.mrf.mxu0 }
0x1898   :  { %v1169_v2 = vadd.f32 %v1313_v25, %v1168_v1 }
0x189a   :  { %v1276_v3 = vmul.f32 -1.442695, %v1169_v2 }
0x189c   :  { %1390 = vpow2.f32 %v1276_v3 }
0x18a2   :  { %v1391_v4 = vpop.eup %1390 }
0x18a3   :  { %v1182_v5 = vadd.f32 1.0, %v1391_v4 }
0x18a5   :  { %1392 = vrcp.f32 %v1182_v5  ;;  %v1224_v42 = vand.u32 2147483648, %v1182_v5  ;;  %v1222_v7 = vand.u32 2147483647, %v1182_v5  ;;  %vm1218_vm3 = vweird.f32 %v1182_v5 }
0x18a7   :  { %v1225_v12 = vor.u32 1.1754944e-38, %v1224_v42  ;;  %vm1223_vm14 = vcmp.eq.f32.partialorder %v1222_v7, 8.507059e+37 }
0x18ab   :  { %v1393_v6 = vpop.eup %1392 }
0x18ac   :  { %v1214_v30 = vmul.f32 %v1393_v6, %v1182_v5  ;;  %vm1219_vm12 = vweird.f32 %v1393_v6 }
0x18ad   :  { %vm1220_vm4 = vmor %vm1218_vm3, %vm1219_vm12 }
0x18ae   :  { %v1215_v49 = vsub.f32 1.0, %v1214_v30 }
0x18b0   :  { %v1216_v45 = vmul.f32 %v1393_v6, %v1215_v49 }
0x18b2   :  { %v1217_v11 = vadd.f32 %v1393_v6, %v1216_v45 }
0x18b4   :  { %v1221_v13 = vsel %vm1220_vm4, %v1393_v6, %v1217_v11 }
0x18b5   :  { %v1226_v16 = vsel %vm1223_vm14, %v1225_v12, %v1221_v13 }
0x18b6   :  { %1230 = vst [vmem:[%s1872_s17 + $0x10] sm:$0x3] %v1226_v16 }

</bundles_post_ra>
